<compile_context>
chip_gen: v7x
topology: tpu7x:2x2x1
jax: 0.10.0
libtpu: 0.0.40
codegen_flags: <defaults>
</compile_context>

<pallas_src>
import functools

import jax
import jax.numpy as jnp
import numpy as np
from jax.experimental import pallas as pl
from jax.experimental.pallas import tpu as pltpu

LRELU_SLOPE = 0.2


# ------------------------------ Pallas kernel ------------------------------- #

def _dis_std_kernel(*refs, n_layers, slope):
    """Full multi-scale discriminator forward for ONE image (one grid step).

    Ref order (inputs):
      x_ref                       (1, H, W*C)            bf16  scale-0 input, NHWC-flat
      per scale s:
        per conv layer l:
          r_ref                   (4, Ho, Hin)           bf16  one-hot row gathers (per kh)
          m_ref                   (4, Win*Cin, Wo*Cout)  bf16  col-select + weights (per kh)
          b_ref                   (1, Wo*Cout)           f32   bias tiled over Wo
        wl_ref                    (Wo*D, Wo)             f32   final 1x1 conv, kron(I_Wo, w)
        bl_ref                    (1, 1)                 f32
        if s is not the last scale:
          ph_ref                  (Hp, H)                f32   row pool (1/count folded in)
          pwk_ref                 (W*C, Wp*C)            f32   col pool kron I_C (1/count folded)
    Outputs: one (1, Ho_s, Wo_s) f32 logit map per scale.
    """
    num_scales = len(n_layers)
    out_refs = refs[-num_scales:]
    pos = 1
    cur = refs[0][0]                                    # (H, W*C) bf16, this scale's input
    for s, nl in enumerate(n_layers):
        h = cur
        for _ in range(nl):
            r_ref, m_ref, b_ref = refs[pos], refs[pos + 1], refs[pos + 2]
            pos += 3
            hb = h.astype(jnp.bfloat16)
            acc = None
            for kh in range(4):                         # static unroll over kernel rows
                # one-hot row gather (exact in bf16), then folded col-select+weight matmul
                tap = jnp.dot(r_ref[kh], hb, preferred_element_type=jnp.float32)
                term = jnp.dot(tap.astype(jnp.bfloat16), m_ref[kh],
                               preferred_element_type=jnp.float32)
                acc = term if acc is None else acc + term
            pre = acc + b_ref[...]
            h = jnp.maximum(pre, slope * pre)           # LeakyReLU (VPU max form)
        wl_ref, bl_ref = refs[pos], refs[pos + 1]
        pos += 2
        logits = jnp.dot(h, wl_ref[...], preferred_element_type=jnp.float32)
        out_refs[s][0] = (logits + bl_ref[...]).astype(out_refs[s].dtype)
        if s + 1 < num_scales:                          # downsample for the next scale
            ph_ref, pwk_ref = refs[pos], refs[pos + 1]
            pos += 2
            p = jnp.dot(ph_ref[...], cur.astype(jnp.float32),
                        preferred_element_type=jnp.float32)
            p = jnp.dot(p, pwk_ref[...], preferred_element_type=jnp.float32)
            cur = p.astype(jnp.bfloat16)                # (Hp, Wp*C), next scale's input


# --------------------------- static matrix builders ------------------------- #

def _reflect_index(i, size, pad_type):
    if 0 <= i < size:
        return i
    if pad_type == "reflect":
        return -i if i < 0 else 2 * size - 2 - i
    return None  # zero padding: out-of-bounds tap contributes 0


def _row_gather_np(hin, pad_type):
    """(4, Ho, Hin) one-hot selectors: tap kh, output row io -> input row."""
    ho = (hin + 2 - 4) // 2 + 1
    r = np.zeros((4, ho, hin), np.float32)
    for kh in range(4):
        for io in range(ho):
            src = _reflect_index(2 * io - 1 + kh, hin, pad_type)
            if src is not None:
                r[kh, io, src] = 1.0
    return r


def _col_select_np(win, pad_type):
    """(4, Win, Wo) one-hot selectors: tap kw, input col j -> output col jo."""
    wo = (win + 2 - 4) // 2 + 1
    c = np.zeros((4, win, wo), np.float32)
    for kw in range(4):
        for jo in range(wo):
            src = _reflect_index(2 * jo - 1 + kw, win, pad_type)
            if src is not None:
                c[kw, src, jo] = 1.0
    return c


def _conv_weight_matrices(w, win, pad_type):
    """(4, Win*Cin, Wo*Cout): for each kh, fold the kw column selection (with
    reflect padding) and the conv weights into one right-hand MXU operand."""
    cout, cin = int(w.shape[0]), int(w.shape[1])
    csel = _col_select_np(win, pad_type)                     # (4, Win, Wo)
    wo = csel.shape[2]
    blocks = []
    for kh in range(4):
        m = jnp.zeros((win * cin, wo * cout), jnp.float32)
        for kw in range(4):
            wt = jnp.transpose(w[:, :, kh, kw])              # (Cin, Cout)
            m = m + jnp.kron(jnp.asarray(csel[kw]), wt)      # (Win*Cin, Wo*Cout)
        blocks.append(m)
    return jnp.stack(blocks, axis=0)


def _pool_matrices_np(h, w, c):
    """AvgPool2d(3, stride=2, pad=1, count_include_pad=False) as two matmuls in
    the (rows, W*C) layout; separable 1/count factors are folded in (exact)."""
    ho, wo = (h + 2 - 3) // 2 + 1, (w + 2 - 3) // 2 + 1

    def win_mat(size, osize):
        m = np.zeros((osize, size), np.float32)
        for o in range(osize):
            lo = 2 * o - 1
            for i in range(max(lo, 0), min(lo + 3, size)):
                m[o, i] = 1.0
        return m

    ph = win_mat(h, ho)
    pw = win_mat(w, wo)
    ph_scaled = ph / ph.sum(axis=1, keepdims=True)           # (Ho, H)
    pw_scaled = (pw / pw.sum(axis=1, keepdims=True)).T       # (W, Wo)
    pwk = np.kron(pw_scaled, np.eye(c, dtype=np.float32))    # (W*C, Wo*C)
    return ph_scaled, pwk, ho, wo


# --------------------------- parameters & forward --------------------------- #

def init_dis_std_params(key, input_dim, dim, n_layer, num_scales):
    """Deterministic synthetic weights matching the PyTorch module's shapes."""
    scales = []
    for _ in range(num_scales):
        layers = []
        cin, cout = input_dim, dim
        for _ in range(n_layer):
            key, wk, bk = jax.random.split(key, 3)
            fan_in = cin * 4 * 4
            w = jax.random.normal(wk, (cout, cin, 4, 4), jnp.float32) / jnp.sqrt(float(fan_in))
            b = jax.random.normal(bk, (cout,), jnp.float32) * 0.01
            layers.append((w, b))
            cin, cout = cout, cout * 2
        key, wk, bk = jax.random.split(key, 3)
        w = jax.random.normal(wk, (1, cin, 1, 1), jnp.float32) / jnp.sqrt(float(cin))
        b = jax.random.normal(bk, (1,), jnp.float32) * 0.01
        layers.append((w, b))
        scales.append(layers)
    return scales


def dis_std_forward(x_nchw, params, pad_type="reflect", slope=LRELU_SLOPE):
    """Returns a list (one per scale) of NCHW logits, like Dis_std.forward."""
    n, c, h, w = x_nchw.shape
    num_scales = len(params)

    # Single prep op: NCHW -> NHWC-flat (rows, W*C), bf16 for the MXU.
    x_flat = jnp.transpose(x_nchw, (0, 2, 3, 1)).reshape(n, h, w * c).astype(jnp.bfloat16)

    def full_spec(shape):
        nd = len(shape)
        return pl.BlockSpec(shape, lambda i, _nd=nd: (0,) * _nd)

    inputs = [x_flat]
    in_specs = [pl.BlockSpec((1, h, w * c), lambda i: (i, 0, 0))]
    n_layers, out_shapes, out_specs = [], [], []

    sc_h, sc_w = h, w                                   # this scale's input spatial dims
    for s, layers in enumerate(params):
        *convs, (w_last, b_last) = layers
        n_layers.append(len(convs))
        cur_h, cur_w = sc_h, sc_w
        for (wl, bl) in convs:
            cout = int(wl.shape[0])
            r = jnp.asarray(_row_gather_np(cur_h, pad_type), jnp.bfloat16)
            m = _conv_weight_matrices(wl, cur_w, pad_type).astype(jnp.bfloat16)
            ho, wo = (cur_h - 2) // 2 + 1, (cur_w - 2) // 2 + 1
            btile = jnp.tile(bl.astype(jnp.float32), wo).reshape(1, wo * cout)
            inputs += [r, m, btile]
            in_specs += [full_spec(r.shape), full_spec(m.shape), full_spec(btile.shape)]
            cur_h, cur_w = ho, wo
        d_last = int(w_last.shape[1])
        wv = w_last.reshape(d_last).astype(jnp.float32)
        wl_kron = jnp.kron(jnp.eye(cur_w, dtype=jnp.float32), wv.reshape(d_last, 1))
        bl2 = b_last.reshape(1, 1).astype(jnp.float32)
        inputs += [wl_kron, bl2]
        in_specs += [full_spec(wl_kron.shape), full_spec(bl2.shape)]
        out_shapes.append(jax.ShapeDtypeStruct((n, cur_h, cur_w), jnp.float32))
        out_specs.append(pl.BlockSpec((1, cur_h, cur_w), lambda i: (i, 0, 0)))
        if s + 1 < num_scales:
            ph, pwk, sc_h, sc_w = _pool_matrices_np(sc_h, sc_w, c)
            inputs += [jnp.asarray(ph), jnp.asarray(pwk)]
            in_specs += [full_spec(ph.shape), full_spec(pwk.shape)]

    kernel = functools.partial(_dis_std_kernel, n_layers=tuple(n_layers), slope=slope)
    outs = pl.pallas_call(
        kernel,
        out_shape=tuple(out_shapes),
        grid=(n,),
        in_specs=in_specs,
        out_specs=tuple(out_specs),
        compiler_params=pltpu.CompilerParams(dimension_semantics=("parallel",)),
    )(*inputs)
    # NCHW logits per scale, as in the PyTorch module.
    return [o.reshape(n, 1, o.shape[1], o.shape[2]) for o in outs]


if __name__ == "__main__":
    key = jax.random.PRNGKey(0)
    key, xk = jax.random.split(key)
    N, C, H, W = 2, 4, 16, 16
    x = jax.random.normal(xk, (N, C, H, W), jnp.float32)

    params = init_dis_std_params(key, input_dim=C, dim=8, n_layer=2, num_scales=2)

    fwd = jax.jit(dis_std_forward)
    outs = jax.block_until_ready(fwd(x, params))

    expected = [(N, 1, H // 4, W // 4), (N, 1, H // 8, W // 8)]
    assert [tuple(o.shape) for o in outs] == expected, [o.shape for o in outs]
    assert all(bool(jnp.all(jnp.isfinite(o))) for o in outs)
    print("KERNEL_OK")
</pallas_src>

<mosaic_0001>
module attributes {stable_mosaic.version = 11 : i64} {
  func.func @_dis_std_kernel(%arg0: i32, %arg1: memref<1x16x64xbf16, #tpu.memory_space<vmem>>, %arg2: memref<4x8x16xbf16, #tpu.memory_space<vmem>>, %arg3: memref<4x64x64xbf16, #tpu.memory_space<vmem>>, %arg4: memref<1x64xf32, #tpu.memory_space<vmem>>, %arg5: memref<4x4x8xbf16, #tpu.memory_space<vmem>>, %arg6: memref<4x64x64xbf16, #tpu.memory_space<vmem>>, %arg7: memref<1x64xf32, #tpu.memory_space<vmem>>, %arg8: memref<64x4xf32, #tpu.memory_space<vmem>>, %arg9: memref<1x1xf32, #tpu.memory_space<vmem>>, %arg10: memref<8x16xf32, #tpu.memory_space<vmem>>, %arg11: memref<64x32xf32, #tpu.memory_space<vmem>>, %arg12: memref<4x4x8xbf16, #tpu.memory_space<vmem>>, %arg13: memref<4x32x32xbf16, #tpu.memory_space<vmem>>, %arg14: memref<1x32xf32, #tpu.memory_space<vmem>>, %arg15: memref<4x2x4xbf16, #tpu.memory_space<vmem>>, %arg16: memref<4x32x32xbf16, #tpu.memory_space<vmem>>, %arg17: memref<1x32xf32, #tpu.memory_space<vmem>>, %arg18: memref<32x2xf32, #tpu.memory_space<vmem>>, %arg19: memref<1x1xf32, #tpu.memory_space<vmem>>, %arg20: memref<1x4x4xf32, #tpu.memory_space<vmem>>, %arg21: memref<1x2x2xf32, #tpu.memory_space<vmem>>) attributes {dimension_semantics = [#tpu.dimension_semantics<parallel>], iteration_bounds = array<i64: 2>, scalar_prefetch = 0 : i64, scratch_operands = 0 : i64, tpu.core_type = #tpu.core_type<tc>, window_params = [{transform_indices = @transform_0, window_bounds = array<i64: 1, 16, 64>}, {pipeline_mode = #tpu.pipeline_mode<synchronous>, transform_indices = @transform_1, window_bounds = array<i64: 4, 8, 16>}, {pipeline_mode = #tpu.pipeline_mode<synchronous>, transform_indices = @transform_2, window_bounds = array<i64: 4, 64, 64>}, {pipeline_mode = #tpu.pipeline_mode<synchronous>, transform_indices = @transform_3, window_bounds = array<i64: 1, 64>}, {pipeline_mode = #tpu.pipeline_mode<synchronous>, transform_indices = @transform_4, window_bounds = array<i64: 4, 4, 8>}, {pipeline_mode = #tpu.pipeline_mode<synchronous>, transform_indices = @transform_5, window_bounds = array<i64: 4, 64, 64>}, {pipeline_mode = #tpu.pipeline_mode<synchronous>, transform_indices = @transform_6, window_bounds = array<i64: 1, 64>}, {pipeline_mode = #tpu.pipeline_mode<synchronous>, transform_indices = @transform_7, window_bounds = array<i64: 64, 4>}, {pipeline_mode = #tpu.pipeline_mode<synchronous>, transform_indices = @transform_8, window_bounds = array<i64: 1, 1>}, {pipeline_mode = #tpu.pipeline_mode<synchronous>, transform_indices = @transform_9, window_bounds = array<i64: 8, 16>}, {pipeline_mode = #tpu.pipeline_mode<synchronous>, transform_indices = @transform_10, window_bounds = array<i64: 64, 32>}, {pipeline_mode = #tpu.pipeline_mode<synchronous>, transform_indices = @transform_11, window_bounds = array<i64: 4, 4, 8>}, {pipeline_mode = #tpu.pipeline_mode<synchronous>, transform_indices = @transform_12, window_bounds = array<i64: 4, 32, 32>}, {pipeline_mode = #tpu.pipeline_mode<synchronous>, transform_indices = @transform_13, window_bounds = array<i64: 1, 32>}, {pipeline_mode = #tpu.pipeline_mode<synchronous>, transform_indices = @transform_14, window_bounds = array<i64: 4, 2, 4>}, {pipeline_mode = #tpu.pipeline_mode<synchronous>, transform_indices = @transform_15, window_bounds = array<i64: 4, 32, 32>}, {pipeline_mode = #tpu.pipeline_mode<synchronous>, transform_indices = @transform_16, window_bounds = array<i64: 1, 32>}, {pipeline_mode = #tpu.pipeline_mode<synchronous>, transform_indices = @transform_17, window_bounds = array<i64: 32, 2>}, {pipeline_mode = #tpu.pipeline_mode<synchronous>, transform_indices = @transform_18, window_bounds = array<i64: 1, 1>}, {transform_indices = @transform_19, window_bounds = array<i64: 1, 4, 4>}, {transform_indices = @transform_20, window_bounds = array<i64: 1, 2, 2>}]} {
    %c0 = arith.constant 0 : index
    %c0_0 = arith.constant 0 : index
    %c0_1 = arith.constant 0 : index
    %0 = vector.load %arg1[%c0, %c0_0, %c0_1] : memref<1x16x64xbf16, #tpu.memory_space<vmem>>, vector<1x16x64xbf16>
    %1 = vector.shape_cast %0 : vector<1x16x64xbf16> to vector<16x64xbf16>
    %c0_2 = arith.constant 0 : index
    %c0_3 = arith.constant 0 : index
    %c0_4 = arith.constant 0 : index
    %2 = vector.load %arg2[%c0_2, %c0_3, %c0_4] : memref<4x8x16xbf16, #tpu.memory_space<vmem>>, vector<1x8x16xbf16>
    %3 = vector.shape_cast %2 : vector<1x8x16xbf16> to vector<8x16xbf16>
    %cst = arith.constant dense<0.000000e+00> : vector<8x64xf32>
    %4 = tpu.matmul %3, %1, %cst {dimension_numbers = #tpu.dot_dimension_numbers<[1], [0], [0], [1], [0, 0, 1, 1], [], []>} : vector<8x16xbf16>, vector<16x64xbf16>, vector<8x64xf32> -> vector<8x64xf32>
    %5 = arith.truncf %4 : vector<8x64xf32> to vector<8x64xbf16>
    %c0_5 = arith.constant 0 : index
    %c0_6 = arith.constant 0 : index
    %c0_7 = arith.constant 0 : index
    %6 = vector.load %arg3[%c0_5, %c0_6, %c0_7] : memref<4x64x64xbf16, #tpu.memory_space<vmem>>, vector<1x64x64xbf16>
    %7 = vector.shape_cast %6 : vector<1x64x64xbf16> to vector<64x64xbf16>
    %cst_8 = arith.constant dense<0.000000e+00> : vector<8x64xf32>
    %8 = tpu.matmul %5, %7, %cst_8 {dimension_numbers = #tpu.dot_dimension_numbers<[1], [0], [0], [1], [0, 0, 1, 1], [], []>} : vector<8x64xbf16>, vector<64x64xbf16>, vector<8x64xf32> -> vector<8x64xf32>
    %c1 = arith.constant 1 : index
    %c0_9 = arith.constant 0 : index
    %c0_10 = arith.constant 0 : index
    %9 = vector.load %arg2[%c1, %c0_9, %c0_10] : memref<4x8x16xbf16, #tpu.memory_space<vmem>>, vector<1x8x16xbf16>
    %10 = vector.shape_cast %9 : vector<1x8x16xbf16> to vector<8x16xbf16>
    %cst_11 = arith.constant dense<0.000000e+00> : vector<8x64xf32>
    %11 = tpu.matmul %10, %1, %cst_11 {dimension_numbers = #tpu.dot_dimension_numbers<[1], [0], [0], [1], [0, 0, 1, 1], [], []>} : vector<8x16xbf16>, vector<16x64xbf16>, vector<8x64xf32> -> vector<8x64xf32>
    %12 = arith.truncf %11 : vector<8x64xf32> to vector<8x64xbf16>
    %c1_12 = arith.constant 1 : index
    %c0_13 = arith.constant 0 : index
    %c0_14 = arith.constant 0 : index
    %13 = vector.load %arg3[%c1_12, %c0_13, %c0_14] : memref<4x64x64xbf16, #tpu.memory_space<vmem>>, vector<1x64x64xbf16>
    %14 = vector.shape_cast %13 : vector<1x64x64xbf16> to vector<64x64xbf16>
    %cst_15 = arith.constant dense<0.000000e+00> : vector<8x64xf32>
    %15 = tpu.matmul %12, %14, %cst_15 {dimension_numbers = #tpu.dot_dimension_numbers<[1], [0], [0], [1], [0, 0, 1, 1], [], []>} : vector<8x64xbf16>, vector<64x64xbf16>, vector<8x64xf32> -> vector<8x64xf32>
    %16 = arith.addf %8, %15 : vector<8x64xf32>
    %c2 = arith.constant 2 : index
    %c0_16 = arith.constant 0 : index
    %c0_17 = arith.constant 0 : index
    %17 = vector.load %arg2[%c2, %c0_16, %c0_17] : memref<4x8x16xbf16, #tpu.memory_space<vmem>>, vector<1x8x16xbf16>
    %18 = vector.shape_cast %17 : vector<1x8x16xbf16> to vector<8x16xbf16>
    %cst_18 = arith.constant dense<0.000000e+00> : vector<8x64xf32>
    %19 = tpu.matmul %18, %1, %cst_18 {dimension_numbers = #tpu.dot_dimension_numbers<[1], [0], [0], [1], [0, 0, 1, 1], [], []>} : vector<8x16xbf16>, vector<16x64xbf16>, vector<8x64xf32> -> vector<8x64xf32>
    %20 = arith.truncf %19 : vector<8x64xf32> to vector<8x64xbf16>
    %c2_19 = arith.constant 2 : index
    %c0_20 = arith.constant 0 : index
    %c0_21 = arith.constant 0 : index
    %21 = vector.load %arg3[%c2_19, %c0_20, %c0_21] : memref<4x64x64xbf16, #tpu.memory_space<vmem>>, vector<1x64x64xbf16>
    %22 = vector.shape_cast %21 : vector<1x64x64xbf16> to vector<64x64xbf16>
    %cst_22 = arith.constant dense<0.000000e+00> : vector<8x64xf32>
    %23 = tpu.matmul %20, %22, %cst_22 {dimension_numbers = #tpu.dot_dimension_numbers<[1], [0], [0], [1], [0, 0, 1, 1], [], []>} : vector<8x64xbf16>, vector<64x64xbf16>, vector<8x64xf32> -> vector<8x64xf32>
    %24 = arith.addf %16, %23 : vector<8x64xf32>
    %c3 = arith.constant 3 : index
    %c0_23 = arith.constant 0 : index
    %c0_24 = arith.constant 0 : index
    %25 = vector.load %arg2[%c3, %c0_23, %c0_24] : memref<4x8x16xbf16, #tpu.memory_space<vmem>>, vector<1x8x16xbf16>
    %26 = vector.shape_cast %25 : vector<1x8x16xbf16> to vector<8x16xbf16>
    %cst_25 = arith.constant dense<0.000000e+00> : vector<8x64xf32>
    %27 = tpu.matmul %26, %1, %cst_25 {dimension_numbers = #tpu.dot_dimension_numbers<[1], [0], [0], [1], [0, 0, 1, 1], [], []>} : vector<8x16xbf16>, vector<16x64xbf16>, vector<8x64xf32> -> vector<8x64xf32>
    %28 = arith.truncf %27 : vector<8x64xf32> to vector<8x64xbf16>
    %c3_26 = arith.constant 3 : index
    %c0_27 = arith.constant 0 : index
    %c0_28 = arith.constant 0 : index
    %29 = vector.load %arg3[%c3_26, %c0_27, %c0_28] : memref<4x64x64xbf16, #tpu.memory_space<vmem>>, vector<1x64x64xbf16>
    %30 = vector.shape_cast %29 : vector<1x64x64xbf16> to vector<64x64xbf16>
    %cst_29 = arith.constant dense<0.000000e+00> : vector<8x64xf32>
    %31 = tpu.matmul %28, %30, %cst_29 {dimension_numbers = #tpu.dot_dimension_numbers<[1], [0], [0], [1], [0, 0, 1, 1], [], []>} : vector<8x64xbf16>, vector<64x64xbf16>, vector<8x64xf32> -> vector<8x64xf32>
    %32 = arith.addf %24, %31 : vector<8x64xf32>
    %c0_30 = arith.constant 0 : index
    %c0_31 = arith.constant 0 : index
    %33 = vector.load %arg4[%c0_30, %c0_31] : memref<1x64xf32, #tpu.memory_space<vmem>>, vector<1x64xf32>
    %34 = vector.broadcast %33 : vector<1x64xf32> to vector<8x64xf32>
    %35 = arith.addf %32, %34 : vector<8x64xf32>
    %cst_32 = arith.constant 2.000000e-01 : f32
    %36 = vector.broadcast %cst_32 : f32 to vector<8x64xf32>
    %37 = arith.mulf %36, %35 : vector<8x64xf32>
    %38 = arith.maximumf %35, %37 : vector<8x64xf32>
    %39 = arith.truncf %38 : vector<8x64xf32> to vector<8x64xbf16>
    %c0_33 = arith.constant 0 : index
    %c0_34 = arith.constant 0 : index
    %c0_35 = arith.constant 0 : index
    %40 = vector.load %arg5[%c0_33, %c0_34, %c0_35] : memref<4x4x8xbf16, #tpu.memory_space<vmem>>, vector<1x4x8xbf16>
    %41 = vector.shape_cast %40 : vector<1x4x8xbf16> to vector<4x8xbf16>
    %cst_36 = arith.constant dense<0.000000e+00> : vector<4x64xf32>
    %42 = tpu.matmul %41, %39, %cst_36 {dimension_numbers = #tpu.dot_dimension_numbers<[1], [0], [0], [1], [0, 0, 1, 1], [], []>} : vector<4x8xbf16>, vector<8x64xbf16>, vector<4x64xf32> -> vector<4x64xf32>
    %43 = arith.truncf %42 : vector<4x64xf32> to vector<4x64xbf16>
    %c0_37 = arith.constant 0 : index
    %c0_38 = arith.constant 0 : index
    %c0_39 = arith.constant 0 : index
    %44 = vector.load %arg6[%c0_37, %c0_38, %c0_39] : memref<4x64x64xbf16, #tpu.memory_space<vmem>>, vector<1x64x64xbf16>
    %45 = vector.shape_cast %44 : vector<1x64x64xbf16> to vector<64x64xbf16>
    %cst_40 = arith.constant dense<0.000000e+00> : vector<4x64xf32>
    %46 = tpu.matmul %43, %45, %cst_40 {dimension_numbers = #tpu.dot_dimension_numbers<[1], [0], [0], [1], [0, 0, 1, 1], [], []>} : vector<4x64xbf16>, vector<64x64xbf16>, vector<4x64xf32> -> vector<4x64xf32>
    %c1_41 = arith.constant 1 : index
    %c0_42 = arith.constant 0 : index
    %c0_43 = arith.constant 0 : index
    %47 = vector.load %arg5[%c1_41, %c0_42, %c0_43] : memref<4x4x8xbf16, #tpu.memory_space<vmem>>, vector<1x4x8xbf16>
    %48 = vector.shape_cast %47 : vector<1x4x8xbf16> to vector<4x8xbf16>
    %cst_44 = arith.constant dense<0.000000e+00> : vector<4x64xf32>
    %49 = tpu.matmul %48, %39, %cst_44 {dimension_numbers = #tpu.dot_dimension_numbers<[1], [0], [0], [1], [0, 0, 1, 1], [], []>} : vector<4x8xbf16>, vector<8x64xbf16>, vector<4x64xf32> -> vector<4x64xf32>
    %50 = arith.truncf %49 : vector<4x64xf32> to vector<4x64xbf16>
    %c1_45 = arith.constant 1 : index
    %c0_46 = arith.constant 0 : index
    %c0_47 = arith.constant 0 : index
    %51 = vector.load %arg6[%c1_45, %c0_46, %c0_47] : memref<4x64x64xbf16, #tpu.memory_space<vmem>>, vector<1x64x64xbf16>
    %52 = vector.shape_cast %51 : vector<1x64x64xbf16> to vector<64x64xbf16>
    %cst_48 = arith.constant dense<0.000000e+00> : vector<4x64xf32>
    %53 = tpu.matmul %50, %52, %cst_48 {dimension_numbers = #tpu.dot_dimension_numbers<[1], [0], [0], [1], [0, 0, 1, 1], [], []>} : vector<4x64xbf16>, vector<64x64xbf16>, vector<4x64xf32> -> vector<4x64xf32>
    %54 = arith.addf %46, %53 : vector<4x64xf32>
    %c2_49 = arith.constant 2 : index
    %c0_50 = arith.constant 0 : index
    %c0_51 = arith.constant 0 : index
    %55 = vector.load %arg5[%c2_49, %c0_50, %c0_51] : memref<4x4x8xbf16, #tpu.memory_space<vmem>>, vector<1x4x8xbf16>
    %56 = vector.shape_cast %55 : vector<1x4x8xbf16> to vector<4x8xbf16>
    %cst_52 = arith.constant dense<0.000000e+00> : vector<4x64xf32>
    %57 = tpu.matmul %56, %39, %cst_52 {dimension_numbers = #tpu.dot_dimension_numbers<[1], [0], [0], [1], [0, 0, 1, 1], [], []>} : vector<4x8xbf16>, vector<8x64xbf16>, vector<4x64xf32> -> vector<4x64xf32>
    %58 = arith.truncf %57 : vector<4x64xf32> to vector<4x64xbf16>
    %c2_53 = arith.constant 2 : index
    %c0_54 = arith.constant 0 : index
    %c0_55 = arith.constant 0 : index
    %59 = vector.load %arg6[%c2_53, %c0_54, %c0_55] : memref<4x64x64xbf16, #tpu.memory_space<vmem>>, vector<1x64x64xbf16>
    %60 = vector.shape_cast %59 : vector<1x64x64xbf16> to vector<64x64xbf16>
    %cst_56 = arith.constant dense<0.000000e+00> : vector<4x64xf32>
    %61 = tpu.matmul %58, %60, %cst_56 {dimension_numbers = #tpu.dot_dimension_numbers<[1], [0], [0], [1], [0, 0, 1, 1], [], []>} : vector<4x64xbf16>, vector<64x64xbf16>, vector<4x64xf32> -> vector<4x64xf32>
    %62 = arith.addf %54, %61 : vector<4x64xf32>
    %c3_57 = arith.constant 3 : index
    %c0_58 = arith.constant 0 : index
    %c0_59 = arith.constant 0 : index
    %63 = vector.load %arg5[%c3_57, %c0_58, %c0_59] : memref<4x4x8xbf16, #tpu.memory_space<vmem>>, vector<1x4x8xbf16>
    %64 = vector.shape_cast %63 : vector<1x4x8xbf16> to vector<4x8xbf16>
    %cst_60 = arith.constant dense<0.000000e+00> : vector<4x64xf32>
    %65 = tpu.matmul %64, %39, %cst_60 {dimension_numbers = #tpu.dot_dimension_numbers<[1], [0], [0], [1], [0, 0, 1, 1], [], []>} : vector<4x8xbf16>, vector<8x64xbf16>, vector<4x64xf32> -> vector<4x64xf32>
    %66 = arith.truncf %65 : vector<4x64xf32> to vector<4x64xbf16>
    %c3_61 = arith.constant 3 : index
    %c0_62 = arith.constant 0 : index
    %c0_63 = arith.constant 0 : index
    %67 = vector.load %arg6[%c3_61, %c0_62, %c0_63] : memref<4x64x64xbf16, #tpu.memory_space<vmem>>, vector<1x64x64xbf16>
    %68 = vector.shape_cast %67 : vector<1x64x64xbf16> to vector<64x64xbf16>
    %cst_64 = arith.constant dense<0.000000e+00> : vector<4x64xf32>
    %69 = tpu.matmul %66, %68, %cst_64 {dimension_numbers = #tpu.dot_dimension_numbers<[1], [0], [0], [1], [0, 0, 1, 1], [], []>} : vector<4x64xbf16>, vector<64x64xbf16>, vector<4x64xf32> -> vector<4x64xf32>
    %70 = arith.addf %62, %69 : vector<4x64xf32>
    %c0_65 = arith.constant 0 : index
    %c0_66 = arith.constant 0 : index
    %71 = vector.load %arg7[%c0_65, %c0_66] : memref<1x64xf32, #tpu.memory_space<vmem>>, vector<1x64xf32>
    %72 = vector.broadcast %71 : vector<1x64xf32> to vector<4x64xf32>
    %73 = arith.addf %70, %72 : vector<4x64xf32>
    %cst_67 = arith.constant 2.000000e-01 : f32
    %74 = vector.broadcast %cst_67 : f32 to vector<4x64xf32>
    %75 = arith.mulf %74, %73 : vector<4x64xf32>
    %76 = arith.maximumf %73, %75 : vector<4x64xf32>
    %c0_68 = arith.constant 0 : index
    %c0_69 = arith.constant 0 : index
    %77 = vector.load %arg8[%c0_68, %c0_69] : memref<64x4xf32, #tpu.memory_space<vmem>>, vector<64x4xf32>
    %cst_70 = arith.constant dense<0.000000e+00> : vector<4x4xf32>
    %78 = tpu.matmul %76, %77, %cst_70 {dimension_numbers = #tpu.dot_dimension_numbers<[1], [0], [0], [1], [0, 0, 1, 1], [], []>} : vector<4x64xf32>, vector<64x4xf32>, vector<4x4xf32> -> vector<4x4xf32>
    %c0_71 = arith.constant 0 : index
    %c0_72 = arith.constant 0 : index
    %79 = vector.load %arg9[%c0_71, %c0_72] : memref<1x1xf32, #tpu.memory_space<vmem>>, vector<1x1xf32>
    %80 = vector.broadcast %79 : vector<1x1xf32> to vector<4x4xf32>
    %81 = arith.addf %78, %80 : vector<4x4xf32>
    %c0_73 = arith.constant 0 : index
    %c0_74 = arith.constant 0 : index
    %c0_75 = arith.constant 0 : index
    %82 = vector.load %arg20[%c0_73, %c0_74, %c0_75] : memref<1x4x4xf32, #tpu.memory_space<vmem>>, vector<1x4x4xf32>
    %83 = vector.shape_cast %82 : vector<1x4x4xf32> to vector<4x4xf32>
    %84 = vector.shape_cast %81 : vector<4x4xf32> to vector<1x4x4xf32>
    tpu.vector_store %arg20[%c0_73, %c0_74, %c0_75], %84 {strides = array<i32>} : memref<1x4x4xf32, #tpu.memory_space<vmem>>, vector<1x4x4xf32>,
    %c0_76 = arith.constant 0 : index
    %c0_77 = arith.constant 0 : index
    %85 = vector.load %arg10[%c0_76, %c0_77] : memref<8x16xf32, #tpu.memory_space<vmem>>, vector<8x16xf32>
    %86 = arith.extf %1 : vector<16x64xbf16> to vector<16x64xf32>
    %cst_78 = arith.constant dense<0.000000e+00> : vector<8x64xf32>
    %87 = tpu.matmul %85, %86, %cst_78 {dimension_numbers = #tpu.dot_dimension_numbers<[1], [0], [0], [1], [0, 0, 1, 1], [], []>} : vector<8x16xf32>, vector<16x64xf32>, vector<8x64xf32> -> vector<8x64xf32>
    %c0_79 = arith.constant 0 : index
    %c0_80 = arith.constant 0 : index
    %88 = vector.load %arg11[%c0_79, %c0_80] : memref<64x32xf32, #tpu.memory_space<vmem>>, vector<64x32xf32>
    %cst_81 = arith.constant dense<0.000000e+00> : vector<8x32xf32>
    %89 = tpu.matmul %87, %88, %cst_81 {dimension_numbers = #tpu.dot_dimension_numbers<[1], [0], [0], [1], [0, 0, 1, 1], [], []>} : vector<8x64xf32>, vector<64x32xf32>, vector<8x32xf32> -> vector<8x32xf32>
    %90 = arith.truncf %89 : vector<8x32xf32> to vector<8x32xbf16>
    %c0_82 = arith.constant 0 : index
    %c0_83 = arith.constant 0 : index
    %c0_84 = arith.constant 0 : index
    %91 = vector.load %arg12[%c0_82, %c0_83, %c0_84] : memref<4x4x8xbf16, #tpu.memory_space<vmem>>, vector<1x4x8xbf16>
    %92 = vector.shape_cast %91 : vector<1x4x8xbf16> to vector<4x8xbf16>
    %cst_85 = arith.constant dense<0.000000e+00> : vector<4x32xf32>
    %93 = tpu.matmul %92, %90, %cst_85 {dimension_numbers = #tpu.dot_dimension_numbers<[1], [0], [0], [1], [0, 0, 1, 1], [], []>} : vector<4x8xbf16>, vector<8x32xbf16>, vector<4x32xf32> -> vector<4x32xf32>
    %94 = arith.truncf %93 : vector<4x32xf32> to vector<4x32xbf16>
    %c0_86 = arith.constant 0 : index
    %c0_87 = arith.constant 0 : index
    %c0_88 = arith.constant 0 : index
    %95 = vector.load %arg13[%c0_86, %c0_87, %c0_88] : memref<4x32x32xbf16, #tpu.memory_space<vmem>>, vector<1x32x32xbf16>
    %96 = vector.shape_cast %95 : vector<1x32x32xbf16> to vector<32x32xbf16>
    %cst_89 = arith.constant dense<0.000000e+00> : vector<4x32xf32>
    %97 = tpu.matmul %94, %96, %cst_89 {dimension_numbers = #tpu.dot_dimension_numbers<[1], [0], [0], [1], [0, 0, 1, 1], [], []>} : vector<4x32xbf16>, vector<32x32xbf16>, vector<4x32xf32> -> vector<4x32xf32>
    %c1_90 = arith.constant 1 : index
    %c0_91 = arith.constant 0 : index
    %c0_92 = arith.constant 0 : index
    %98 = vector.load %arg12[%c1_90, %c0_91, %c0_92] : memref<4x4x8xbf16, #tpu.memory_space<vmem>>, vector<1x4x8xbf16>
    %99 = vector.shape_cast %98 : vector<1x4x8xbf16> to vector<4x8xbf16>
    %cst_93 = arith.constant dense<0.000000e+00> : vector<4x32xf32>
    %100 = tpu.matmul %99, %90, %cst_93 {dimension_numbers = #tpu.dot_dimension_numbers<[1], [0], [0], [1], [0, 0, 1, 1], [], []>} : vector<4x8xbf16>, vector<8x32xbf16>, vector<4x32xf32> -> vector<4x32xf32>
    %101 = arith.truncf %100 : vector<4x32xf32> to vector<4x32xbf16>
    %c1_94 = arith.constant 1 : index
    %c0_95 = arith.constant 0 : index
    %c0_96 = arith.constant 0 : index
    %102 = vector.load %arg13[%c1_94, %c0_95, %c0_96] : memref<4x32x32xbf16, #tpu.memory_space<vmem>>, vector<1x32x32xbf16>
    %103 = vector.shape_cast %102 : vector<1x32x32xbf16> to vector<32x32xbf16>
    %cst_97 = arith.constant dense<0.000000e+00> : vector<4x32xf32>
    %104 = tpu.matmul %101, %103, %cst_97 {dimension_numbers = #tpu.dot_dimension_numbers<[1], [0], [0], [1], [0, 0, 1, 1], [], []>} : vector<4x32xbf16>, vector<32x32xbf16>, vector<4x32xf32> -> vector<4x32xf32>
    %105 = arith.addf %97, %104 : vector<4x32xf32>
    %c2_98 = arith.constant 2 : index
    %c0_99 = arith.constant 0 : index
    %c0_100 = arith.constant 0 : index
    %106 = vector.load %arg12[%c2_98, %c0_99, %c0_100] : memref<4x4x8xbf16, #tpu.memory_space<vmem>>, vector<1x4x8xbf16>
    %107 = vector.shape_cast %106 : vector<1x4x8xbf16> to vector<4x8xbf16>
    %cst_101 = arith.constant dense<0.000000e+00> : vector<4x32xf32>
    %108 = tpu.matmul %107, %90, %cst_101 {dimension_numbers = #tpu.dot_dimension_numbers<[1], [0], [0], [1], [0, 0, 1, 1], [], []>} : vector<4x8xbf16>, vector<8x32xbf16>, vector<4x32xf32> -> vector<4x32xf32>
    %109 = arith.truncf %108 : vector<4x32xf32> to vector<4x32xbf16>
    %c2_102 = arith.constant 2 : index
    %c0_103 = arith.constant 0 : index
    %c0_104 = arith.constant 0 : index
    %110 = vector.load %arg13[%c2_102, %c0_103, %c0_104] : memref<4x32x32xbf16, #tpu.memory_space<vmem>>, vector<1x32x32xbf16>
    %111 = vector.shape_cast %110 : vector<1x32x32xbf16> to vector<32x32xbf16>
    %cst_105 = arith.constant dense<0.000000e+00> : vector<4x32xf32>
    %112 = tpu.matmul %109, %111, %cst_105 {dimension_numbers = #tpu.dot_dimension_numbers<[1], [0], [0], [1], [0, 0, 1, 1], [], []>} : vector<4x32xbf16>, vector<32x32xbf16>, vector<4x32xf32> -> vector<4x32xf32>
    %113 = arith.addf %105, %112 : vector<4x32xf32>
    %c3_106 = arith.constant 3 : index
    %c0_107 = arith.constant 0 : index
    %c0_108 = arith.constant 0 : index
    %114 = vector.load %arg12[%c3_106, %c0_107, %c0_108] : memref<4x4x8xbf16, #tpu.memory_space<vmem>>, vector<1x4x8xbf16>
    %115 = vector.shape_cast %114 : vector<1x4x8xbf16> to vector<4x8xbf16>
    %cst_109 = arith.constant dense<0.000000e+00> : vector<4x32xf32>
    %116 = tpu.matmul %115, %90, %cst_109 {dimension_numbers = #tpu.dot_dimension_numbers<[1], [0], [0], [1], [0, 0, 1, 1], [], []>} : vector<4x8xbf16>, vector<8x32xbf16>, vector<4x32xf32> -> vector<4x32xf32>
    %117 = arith.truncf %116 : vector<4x32xf32> to vector<4x32xbf16>
    %c3_110 = arith.constant 3 : index
    %c0_111 = arith.constant 0 : index
    %c0_112 = arith.constant 0 : index
    %118 = vector.load %arg13[%c3_110, %c0_111, %c0_112] : memref<4x32x32xbf16, #tpu.memory_space<vmem>>, vector<1x32x32xbf16>
    %119 = vector.shape_cast %118 : vector<1x32x32xbf16> to vector<32x32xbf16>
    %cst_113 = arith.constant dense<0.000000e+00> : vector<4x32xf32>
    %120 = tpu.matmul %117, %119, %cst_113 {dimension_numbers = #tpu.dot_dimension_numbers<[1], [0], [0], [1], [0, 0, 1, 1], [], []>} : vector<4x32xbf16>, vector<32x32xbf16>, vector<4x32xf32> -> vector<4x32xf32>
    %121 = arith.addf %113, %120 : vector<4x32xf32>
    %c0_114 = arith.constant 0 : index
    %c0_115 = arith.constant 0 : index
    %122 = vector.load %arg14[%c0_114, %c0_115] : memref<1x32xf32, #tpu.memory_space<vmem>>, vector<1x32xf32>
    %123 = vector.broadcast %122 : vector<1x32xf32> to vector<4x32xf32>
    %124 = arith.addf %121, %123 : vector<4x32xf32>
    %cst_116 = arith.constant 2.000000e-01 : f32
    %125 = vector.broadcast %cst_116 : f32 to vector<4x32xf32>
    %126 = arith.mulf %125, %124 : vector<4x32xf32>
    %127 = arith.maximumf %124, %126 : vector<4x32xf32>
    %128 = arith.truncf %127 : vector<4x32xf32> to vector<4x32xbf16>
    %c0_117 = arith.constant 0 : index
    %c0_118 = arith.constant 0 : index
    %c0_119 = arith.constant 0 : index
    %129 = vector.load %arg15[%c0_117, %c0_118, %c0_119] : memref<4x2x4xbf16, #tpu.memory_space<vmem>>, vector<1x2x4xbf16>
    %130 = vector.shape_cast %129 : vector<1x2x4xbf16> to vector<2x4xbf16>
    %cst_120 = arith.constant dense<0.000000e+00> : vector<2x32xf32>
    %131 = tpu.matmul %130, %128, %cst_120 {dimension_numbers = #tpu.dot_dimension_numbers<[1], [0], [0], [1], [0, 0, 1, 1], [], []>} : vector<2x4xbf16>, vector<4x32xbf16>, vector<2x32xf32> -> vector<2x32xf32>
    %132 = arith.truncf %131 : vector<2x32xf32> to vector<2x32xbf16>
    %c0_121 = arith.constant 0 : index
    %c0_122 = arith.constant 0 : index
    %c0_123 = arith.constant 0 : index
    %133 = vector.load %arg16[%c0_121, %c0_122, %c0_123] : memref<4x32x32xbf16, #tpu.memory_space<vmem>>, vector<1x32x32xbf16>
    %134 = vector.shape_cast %133 : vector<1x32x32xbf16> to vector<32x32xbf16>
    %cst_124 = arith.constant dense<0.000000e+00> : vector<2x32xf32>
    %135 = tpu.matmul %132, %134, %cst_124 {dimension_numbers = #tpu.dot_dimension_numbers<[1], [0], [0], [1], [0, 0, 1, 1], [], []>} : vector<2x32xbf16>, vector<32x32xbf16>, vector<2x32xf32> -> vector<2x32xf32>
    %c1_125 = arith.constant 1 : index
    %c0_126 = arith.constant 0 : index
    %c0_127 = arith.constant 0 : index
    %136 = vector.load %arg15[%c1_125, %c0_126, %c0_127] : memref<4x2x4xbf16, #tpu.memory_space<vmem>>, vector<1x2x4xbf16>
    %137 = vector.shape_cast %136 : vector<1x2x4xbf16> to vector<2x4xbf16>
    %cst_128 = arith.constant dense<0.000000e+00> : vector<2x32xf32>
    %138 = tpu.matmul %137, %128, %cst_128 {dimension_numbers = #tpu.dot_dimension_numbers<[1], [0], [0], [1], [0, 0, 1, 1], [], []>} : vector<2x4xbf16>, vector<4x32xbf16>, vector<2x32xf32> -> vector<2x32xf32>
    %139 = arith.truncf %138 : vector<2x32xf32> to vector<2x32xbf16>
    %c1_129 = arith.constant 1 : index
    %c0_130 = arith.constant 0 : index
    %c0_131 = arith.constant 0 : index
    %140 = vector.load %arg16[%c1_129, %c0_130, %c0_131] : memref<4x32x32xbf16, #tpu.memory_space<vmem>>, vector<1x32x32xbf16>
    %141 = vector.shape_cast %140 : vector<1x32x32xbf16> to vector<32x32xbf16>
    %cst_132 = arith.constant dense<0.000000e+00> : vector<2x32xf32>
    %142 = tpu.matmul %139, %141, %cst_132 {dimension_numbers = #tpu.dot_dimension_numbers<[1], [0], [0], [1], [0, 0, 1, 1], [], []>} : vector<2x32xbf16>, vector<32x32xbf16>, vector<2x32xf32> -> vector<2x32xf32>
    %143 = arith.addf %135, %142 : vector<2x32xf32>
    %c2_133 = arith.constant 2 : index
    %c0_134 = arith.constant 0 : index
    %c0_135 = arith.constant 0 : index
    %144 = vector.load %arg15[%c2_133, %c0_134, %c0_135] : memref<4x2x4xbf16, #tpu.memory_space<vmem>>, vector<1x2x4xbf16>
    %145 = vector.shape_cast %144 : vector<1x2x4xbf16> to vector<2x4xbf16>
    %cst_136 = arith.constant dense<0.000000e+00> : vector<2x32xf32>
    %146 = tpu.matmul %145, %128, %cst_136 {dimension_numbers = #tpu.dot_dimension_numbers<[1], [0], [0], [1], [0, 0, 1, 1], [], []>} : vector<2x4xbf16>, vector<4x32xbf16>, vector<2x32xf32> -> vector<2x32xf32>
    %147 = arith.truncf %146 : vector<2x32xf32> to vector<2x32xbf16>
    %c2_137 = arith.constant 2 : index
    %c0_138 = arith.constant 0 : index
    %c0_139 = arith.constant 0 : index
    %148 = vector.load %arg16[%c2_137, %c0_138, %c0_139] : memref<4x32x32xbf16, #tpu.memory_space<vmem>>, vector<1x32x32xbf16>
    %149 = vector.shape_cast %148 : vector<1x32x32xbf16> to vector<32x32xbf16>
    %cst_140 = arith.constant dense<0.000000e+00> : vector<2x32xf32>
    %150 = tpu.matmul %147, %149, %cst_140 {dimension_numbers = #tpu.dot_dimension_numbers<[1], [0], [0], [1], [0, 0, 1, 1], [], []>} : vector<2x32xbf16>, vector<32x32xbf16>, vector<2x32xf32> -> vector<2x32xf32>
    %151 = arith.addf %143, %150 : vector<2x32xf32>
    %c3_141 = arith.constant 3 : index
    %c0_142 = arith.constant 0 : index
    %c0_143 = arith.constant 0 : index
    %152 = vector.load %arg15[%c3_141, %c0_142, %c0_143] : memref<4x2x4xbf16, #tpu.memory_space<vmem>>, vector<1x2x4xbf16>
    %153 = vector.shape_cast %152 : vector<1x2x4xbf16> to vector<2x4xbf16>
    %cst_144 = arith.constant dense<0.000000e+00> : vector<2x32xf32>
    %154 = tpu.matmul %153, %128, %cst_144 {dimension_numbers = #tpu.dot_dimension_numbers<[1], [0], [0], [1], [0, 0, 1, 1], [], []>} : vector<2x4xbf16>, vector<4x32xbf16>, vector<2x32xf32> -> vector<2x32xf32>
    %155 = arith.truncf %154 : vector<2x32xf32> to vector<2x32xbf16>
    %c3_145 = arith.constant 3 : index
    %c0_146 = arith.constant 0 : index
    %c0_147 = arith.constant 0 : index
    %156 = vector.load %arg16[%c3_145, %c0_146, %c0_147] : memref<4x32x32xbf16, #tpu.memory_space<vmem>>, vector<1x32x32xbf16>
    %157 = vector.shape_cast %156 : vector<1x32x32xbf16> to vector<32x32xbf16>
    %cst_148 = arith.constant dense<0.000000e+00> : vector<2x32xf32>
    %158 = tpu.matmul %155, %157, %cst_148 {dimension_numbers = #tpu.dot_dimension_numbers<[1], [0], [0], [1], [0, 0, 1, 1], [], []>} : vector<2x32xbf16>, vector<32x32xbf16>, vector<2x32xf32> -> vector<2x32xf32>
    %159 = arith.addf %151, %158 : vector<2x32xf32>
    %c0_149 = arith.constant 0 : index
    %c0_150 = arith.constant 0 : index
    %160 = vector.load %arg17[%c0_149, %c0_150] : memref<1x32xf32, #tpu.memory_space<vmem>>, vector<1x32xf32>
    %161 = vector.broadcast %160 : vector<1x32xf32> to vector<2x32xf32>
    %162 = arith.addf %159, %161 : vector<2x32xf32>
    %cst_151 = arith.constant 2.000000e-01 : f32
    %163 = vector.broadcast %cst_151 : f32 to vector<2x32xf32>
    %164 = arith.mulf %163, %162 : vector<2x32xf32>
    %165 = arith.maximumf %162, %164 : vector<2x32xf32>
    %c0_152 = arith.constant 0 : index
    %c0_153 = arith.constant 0 : index
    %166 = vector.load %arg18[%c0_152, %c0_153] : memref<32x2xf32, #tpu.memory_space<vmem>>, vector<32x2xf32>
    %cst_154 = arith.constant dense<0.000000e+00> : vector<2x2xf32>
    %167 = tpu.matmul %165, %166, %cst_154 {dimension_numbers = #tpu.dot_dimension_numbers<[1], [0], [0], [1], [0, 0, 1, 1], [], []>} : vector<2x32xf32>, vector<32x2xf32>, vector<2x2xf32> -> vector<2x2xf32>
    %c0_155 = arith.constant 0 : index
    %c0_156 = arith.constant 0 : index
    %168 = vector.load %arg19[%c0_155, %c0_156] : memref<1x1xf32, #tpu.memory_space<vmem>>, vector<1x1xf32>
    %169 = vector.broadcast %168 : vector<1x1xf32> to vector<2x2xf32>
    %170 = arith.addf %167, %169 : vector<2x2xf32>
    %c0_157 = arith.constant 0 : index
    %c0_158 = arith.constant 0 : index
    %c0_159 = arith.constant 0 : index
    %171 = vector.load %arg21[%c0_157, %c0_158, %c0_159] : memref<1x2x2xf32, #tpu.memory_space<vmem>>, vector<1x2x2xf32>
    %172 = vector.shape_cast %171 : vector<1x2x2xf32> to vector<2x2xf32>
    %173 = vector.shape_cast %170 : vector<2x2xf32> to vector<1x2x2xf32>
    tpu.vector_store %arg21[%c0_157, %c0_158, %c0_159], %173 {strides = array<i32>} : memref<1x2x2xf32, #tpu.memory_space<vmem>>, vector<1x2x2xf32>,
    return
  }
  func.func @transform_0(%arg0: i32) -> (i32, i32, i32) {
    %c0_i32 = arith.constant 0 : i32
    %c0_i32_0 = arith.constant 0 : i32
    %c0_i32_1 = arith.constant 0 : i32
    return %arg0, %c0_i32, %c0_i32_0 : i32, i32, i32
  }
  func.func @transform_1(%arg0: i32) -> (i32, i32, i32) {
    %c0_i32 = arith.constant 0 : i32
    %c0_i32_0 = arith.constant 0 : i32
    %c0_i32_1 = arith.constant 0 : i32
    %c0_i32_2 = arith.constant 0 : i32
    return %c0_i32, %c0_i32_0, %c0_i32_1 : i32, i32, i32
  }
  func.func @transform_2(%arg0: i32) -> (i32, i32, i32) {
    %c0_i32 = arith.constant 0 : i32
    %c0_i32_0 = arith.constant 0 : i32
    %c0_i32_1 = arith.constant 0 : i32
    %c0_i32_2 = arith.constant 0 : i32
    return %c0_i32, %c0_i32_0, %c0_i32_1 : i32, i32, i32
  }
  func.func @transform_3(%arg0: i32) -> (i32, i32) {
    %c0_i32 = arith.constant 0 : i32
    %c0_i32_0 = arith.constant 0 : i32
    %c0_i32_1 = arith.constant 0 : i32
    return %c0_i32, %c0_i32_0 : i32, i32
  }
  func.func @transform_4(%arg0: i32) -> (i32, i32, i32) {
    %c0_i32 = arith.constant 0 : i32
    %c0_i32_0 = arith.constant 0 : i32
    %c0_i32_1 = arith.constant 0 : i32
    %c0_i32_2 = arith.constant 0 : i32
    return %c0_i32, %c0_i32_0, %c0_i32_1 : i32, i32, i32
  }
  func.func @transform_5(%arg0: i32) -> (i32, i32, i32) {
    %c0_i32 = arith.constant 0 : i32
    %c0_i32_0 = arith.constant 0 : i32
    %c0_i32_1 = arith.constant 0 : i32
    %c0_i32_2 = arith.constant 0 : i32
    return %c0_i32, %c0_i32_0, %c0_i32_1 : i32, i32, i32
  }
  func.func @transform_6(%arg0: i32) -> (i32, i32) {
    %c0_i32 = arith.constant 0 : i32
    %c0_i32_0 = arith.constant 0 : i32
    %c0_i32_1 = arith.constant 0 : i32
    return %c0_i32, %c0_i32_0 : i32, i32
  }
  func.func @transform_7(%arg0: i32) -> (i32, i32) {
    %c0_i32 = arith.constant 0 : i32
    %c0_i32_0 = arith.constant 0 : i32
    %c0_i32_1 = arith.constant 0 : i32
    return %c0_i32, %c0_i32_0 : i32, i32
  }
  func.func @transform_8(%arg0: i32) -> (i32, i32) {
    %c0_i32 = arith.constant 0 : i32
    %c0_i32_0 = arith.constant 0 : i32
    %c0_i32_1 = arith.constant 0 : i32
    return %c0_i32, %c0_i32_0 : i32, i32
  }
  func.func @transform_9(%arg0: i32) -> (i32, i32) {
    %c0_i32 = arith.constant 0 : i32
    %c0_i32_0 = arith.constant 0 : i32
    %c0_i32_1 = arith.constant 0 : i32
    return %c0_i32, %c0_i32_0 : i32, i32
  }
  func.func @transform_10(%arg0: i32) -> (i32, i32) {
    %c0_i32 = arith.constant 0 : i32
    %c0_i32_0 = arith.constant 0 : i32
    %c0_i32_1 = arith.constant 0 : i32
    return %c0_i32, %c0_i32_0 : i32, i32
  }
  func.func @transform_11(%arg0: i32) -> (i32, i32, i32) {
    %c0_i32 = arith.constant 0 : i32
    %c0_i32_0 = arith.constant 0 : i32
    %c0_i32_1 = arith.constant 0 : i32
    %c0_i32_2 = arith.constant 0 : i32
    return %c0_i32, %c0_i32_0, %c0_i32_1 : i32, i32, i32
  }
  func.func @transform_12(%arg0: i32) -> (i32, i32, i32) {
    %c0_i32 = arith.constant 0 : i32
    %c0_i32_0 = arith.constant 0 : i32
    %c0_i32_1 = arith.constant 0 : i32
    %c0_i32_2 = arith.constant 0 : i32
    return %c0_i32, %c0_i32_0, %c0_i32_1 : i32, i32, i32
  }
  func.func @transform_13(%arg0: i32) -> (i32, i32) {
    %c0_i32 = arith.constant 0 : i32
    %c0_i32_0 = arith.constant 0 : i32
    %c0_i32_1 = arith.constant 0 : i32
    return %c0_i32, %c0_i32_0 : i32, i32
  }
  func.func @transform_14(%arg0: i32) -> (i32, i32, i32) {
    %c0_i32 = arith.constant 0 : i32
    %c0_i32_0 = arith.constant 0 : i32
    %c0_i32_1 = arith.constant 0 : i32
    %c0_i32_2 = arith.constant 0 : i32
    return %c0_i32, %c0_i32_0, %c0_i32_1 : i32, i32, i32
  }
  func.func @transform_15(%arg0: i32) -> (i32, i32, i32) {
    %c0_i32 = arith.constant 0 : i32
    %c0_i32_0 = arith.constant 0 : i32
    %c0_i32_1 = arith.constant 0 : i32
    %c0_i32_2 = arith.constant 0 : i32
    return %c0_i32, %c0_i32_0, %c0_i32_1 : i32, i32, i32
  }
  func.func @transform_16(%arg0: i32) -> (i32, i32) {
    %c0_i32 = arith.constant 0 : i32
    %c0_i32_0 = arith.constant 0 : i32
    %c0_i32_1 = arith.constant 0 : i32
    return %c0_i32, %c0_i32_0 : i32, i32
  }
  func.func @transform_17(%arg0: i32) -> (i32, i32) {
    %c0_i32 = arith.constant 0 : i32
    %c0_i32_0 = arith.constant 0 : i32
    %c0_i32_1 = arith.constant 0 : i32
    return %c0_i32, %c0_i32_0 : i32, i32
  }
  func.func @transform_18(%arg0: i32) -> (i32, i32) {
    %c0_i32 = arith.constant 0 : i32
    %c0_i32_0 = arith.constant 0 : i32
    %c0_i32_1 = arith.constant 0 : i32
    return %c0_i32, %c0_i32_0 : i32, i32
  }
  func.func @transform_19(%arg0: i32) -> (i32, i32, i32) {
    %c0_i32 = arith.constant 0 : i32
    %c0_i32_0 = arith.constant 0 : i32
    %c0_i32_1 = arith.constant 0 : i32
    return %arg0, %c0_i32, %c0_i32_0 : i32, i32, i32
  }
  func.func @transform_20(%arg0: i32) -> (i32, i32, i32) {
    %c0_i32 = arith.constant 0 : i32
    %c0_i32_0 = arith.constant 0 : i32
    %c0_i32_1 = arith.constant 0 : i32
    return %arg0, %c0_i32, %c0_i32_0 : i32, i32, i32
  }
}

</mosaic_0001>

<bundles_post_ra>
// kernel: tile.23
= control target key start
LH: loop header
LB: loop body
LE: loop exit
PB: predicated region body
PF: predicated region fallthrough
CT: control target
= control target key end

     0   :  { %s22_s0 = inlined_call_operand.vmem [shape: f32[8], index: 0, kind: input, shape index: {}]   ;;  %s23_s1 = inlined_call_operand.vmem [shape: f32[8,8], index: 1, kind: output, shape index: {}]  }
   0x1   :  { %v4_v0 = vld [vmem:[%s22_s0] ss:$0 sm:$0xff] }
   0x2   :  { %5 = vst [vmem:[%s23_s1] sm:$0xff] %v4_v0 }

// kernel: tile.24
= control target key start
LH: loop header
LB: loop body
LE: loop exit
PB: predicated region body
PF: predicated region fallthrough
CT: control target
= control target key end

     0   :  { %s67_s10 = smov 56   ;;  %s68_s11 = smov 40   ;;  %vm3_vm0 = vcmask 64512   ;;  %vm9_vm1 = vcmask 523712   ;;  %vm15_vm2 = vcmask 458112   ;;  %vm21_vm3 = vcmask 392512   ;;  %s111_s0 = inlined_call_operand.vmem [shape: f32[8,8], index: 0, kind: input, shape index: {}]   ;;  %s112_s1 = inlined_call_operand.vmem [shape: f32[1,64], index: 1, kind: output, shape index: {}]  }
   0x1   :  { %v53_v0 = vld [vmem:[%s111_s0 + $0x7] sm:$0x1]   ;;  %v55_v1 = vld [vmem:[%s111_s0 + $0x5] sm:$0x1]   ;;  %v54_v2 = vld [vmem:[%s111_s0 + $0x6] sm:$0x1]  }
   0x2   :  { %7 = vrot.lane.b32.xlu0 %v53_v0, %s67_s10  ;;  %19 = vrot.lane.b32.xlu1 %v55_v1, %s68_s11  ;;  %v56_v3 = vld [vmem:[%s111_s0 + $0x4] sm:$0x1]   ;;  %v2_v4 = vld [vmem:[%s111_s0] sm:$0x1]   ;;  %s69_s18 = smov 48   ;;  %s70_s19 = smov 32  }
   0x3   :  { %4 = vst.msk [vmem:[#allocation0] sm:$0x1] %vm3_vm0, %v2_v4   ;;  %v57_v5 = vld [vmem:[%s111_s0 + $0x3] sm:$0x1]   ;;  %v58_v6 = vld [vmem:[%s111_s0 + $0x2] sm:$0x1]  }
   0x4   :  { %s71_s24 = smov 24   ;;  %s72_s25 = smov 16   ;;  %v59_v7 = vld [vmem:[%s111_s0 + $0x1] sm:$0x1]   ;;  %vm27_vm4 = vcmask 326912   ;;  %vm33_vm5 = vcmask 261312  }
   0x5   :  { %s73_s0 = smov 8   ;;  %vm39_vm6 = vcmask 195712   ;;  %vm45_vm7 = vcmask 130112  }
   0x6   :  { %13 = vrot.lane.b32.xlu0 %v54_v2, %s69_s18  ;;  %25 = vrot.lane.b32.xlu1 %v56_v3, %s70_s19 }
   0xa   :  { %31 = vrot.lane.b32.xlu0 %v57_v5, %s71_s24  ;;  %37 = vrot.lane.b32.xlu1 %v58_v6, %s72_s25 }
   0xe   :  { %43 = vrot.lane.b32.xlu0 %v59_v7, %s73_s0 }
  0x74   :  { %v8_v8 = vpop.permute.xlu0 %7   ;;  %v20_v9 = vpop.permute.xlu1 %19  }
  0x75   :  { %10 = vst.msk [vmem:[#allocation0] sm:$0x1] %vm9_vm1, %v8_v8  }
  0x78   :  { %v14_v10 = vpop.permute.xlu0 %13   ;;  %v26_v11 = vpop.permute.xlu1 %25  }
  0x79   :  { %16 = vst.msk [vmem:[#allocation0] sm:$0x1] %vm15_vm2, %v14_v10  }
  0x7a   :  { %22 = vst.msk [vmem:[#allocation0] sm:$0x1] %vm21_vm3, %v20_v9  }
  0x7b   :  { %28 = vst.msk [vmem:[#allocation0] sm:$0x1] %vm27_vm4, %v26_v11  }
  0x7c   :  { %v32_v12 = vpop.permute.xlu0 %31   ;;  %v38_v13 = vpop.permute.xlu1 %37  }
  0x7d   :  { %34 = vst.msk [vmem:[#allocation0] sm:$0x1] %vm33_vm5, %v32_v12  }
  0x7e   :  { %40 = vst.msk [vmem:[#allocation0] sm:$0x1] %vm39_vm6, %v38_v13  }
  0x80   :  { %v44_v14 = vpop.permute.xlu0 %43  }
  0x81   :  { %46 = vst.msk [vmem:[#allocation0] sm:$0x1] %vm45_vm7, %v44_v14  }
  0x88   :  { %v50_v15 = vld [vmem:[#allocation0] sm:$0x1] }
  0x89   :  { %52 = vst [vmem:[%s112_s1] sm:$0x1] %v50_v15 }

// kernel: tile.28
= control target key start
LH: loop header
LB: loop body
LE: loop exit
PB: predicated region body
PF: predicated region fallthrough
CT: control target
= control target key end

     0   :  { %s22_s0 = inlined_call_operand.vmem [shape: f32[16], index: 0, kind: input, shape index: {}]   ;;  %s23_s1 = inlined_call_operand.vmem [shape: f32[4,16], index: 1, kind: output, shape index: {}]  }
   0x1   :  { %v4_v0 = vld [vmem:[%s22_s0] ss:$0 sm:$0xff] }
   0x2   :  { %5 = vst [vmem:[%s23_s1] sm:$0xf] %v4_v0 }

// kernel: tile.29
= control target key start
LH: loop header
LB: loop body
LE: loop exit
PB: predicated region body
PF: predicated region fallthrough
CT: control target
= control target key end

     0   :  { %vm7_vm0 = vcmask 130048   ;;  %s37_s8 = smov 16   ;;  %s38_s9 = smov 32   ;;  %vm13_vm1 = vcmask 523648   ;;  %vm19_vm2 = vcmask 392448   ;;  %vm25_vm3 = vcmask 261248   ;;  %s55_s0 = inlined_call_operand.vmem [shape: f32[4,16], index: 0, kind: input, shape index: {}]   ;;  %s56_s1 = inlined_call_operand.vmem [shape: f32[1,64], index: 1, kind: output, shape index: {}]  }
   0x1   :  { %v4_v0 = vld [vmem:[%s55_s0] sm:$0xf]  ;;  %s36_s0 = smov 48  }
   0x2   :  { %5 = vst [vmem:[#allocation1] sm:$0xf] %v4_v0 }
   0x9   :  { %v10_v1 = vld [vmem:[#allocation1 + $0x3] sm:$0x1]   ;;  %v22_v2 = vld [vmem:[#allocation1 + $0x1] sm:$0x1]   ;;  %v6_v3 = vld [vmem:[#allocation1] sm:$0x1]  }
   0xa   :  { %11 = vrot.lane.b32.xlu0 %v10_v1, %s36_s0  ;;  %23 = vrot.lane.b32.xlu1 %v22_v2, %s37_s8  ;;  %v16_v4 = vld [vmem:[#allocation1 + $0x2] sm:$0x1]   ;;  %8 = vst.msk [vmem:[#allocation0] sm:$0x1] %vm7_vm0, %v6_v3  }
   0xe   :  { %17 = vrot.lane.b32.xlu0 %v16_v4, %s38_s9 }
  0x7c   :  { %v12_v5 = vpop.permute.xlu0 %11   ;;  %v24_v6 = vpop.permute.xlu1 %23  }
  0x7d   :  { %14 = vst.msk [vmem:[#allocation0] sm:$0x1] %vm13_vm1, %v12_v5  }
  0x80   :  { %v18_v7 = vpop.permute.xlu0 %17  }
  0x81   :  { %20 = vst.msk [vmem:[#allocation0] sm:$0x1] %vm19_vm2, %v18_v7  }
  0x82   :  { %26 = vst.msk [vmem:[#allocation0] sm:$0x1] %vm25_vm3, %v24_v6  }
  0x89   :  { %v30_v8 = vld [vmem:[#allocation0] sm:$0x1] }
  0x8a   :  { %32 = vst [vmem:[%s56_s1] sm:$0x1] %v30_v8 }

// kernel: tile.33
= control target key start
LH: loop header
LB: loop body
LE: loop exit
PB: predicated region body
PF: predicated region fallthrough
CT: control target
= control target key end

     0   :  { %s22_s0 = inlined_call_operand.vmem [shape: f32[8], index: 0, kind: input, shape index: {}]   ;;  %s23_s1 = inlined_call_operand.vmem [shape: f32[4,8], index: 1, kind: output, shape index: {}]  }
   0x1   :  { %v4_v0 = vld [vmem:[%s22_s0] ss:$0 sm:$0xff] }
   0x2   :  { %5 = vst [vmem:[%s23_s1] sm:$0xf] %v4_v0 }

// kernel: tile.34
= control target key start
LH: loop header
LB: loop body
LE: loop exit
PB: predicated region body
PF: predicated region fallthrough
CT: control target
= control target key end

     0   :  { %vm7_vm0 = vcmask 64512   ;;  %s37_s8 = smov 8   ;;  %s38_s9 = smov 16   ;;  %vm13_vm1 = vcmask 261312   ;;  %vm19_vm2 = vcmask 195712   ;;  %vm25_vm3 = vcmask 130112   ;;  %s55_s0 = inlined_call_operand.vmem [shape: f32[4,8], index: 0, kind: input, shape index: {}]   ;;  %s56_s1 = inlined_call_operand.vmem [shape: f32[1,32], index: 1, kind: output, shape index: {}]  }
   0x1   :  { %v4_v0 = vld [vmem:[%s55_s0] sm:$0xf]  ;;  %s36_s0 = smov 24  }
   0x2   :  { %5 = vst [vmem:[#allocation1] sm:$0xf] %v4_v0 }
   0x9   :  { %v10_v1 = vld [vmem:[#allocation1 + $0x3] sm:$0x1]   ;;  %v22_v2 = vld [vmem:[#allocation1 + $0x1] sm:$0x1]   ;;  %v6_v3 = vld [vmem:[#allocation1] sm:$0x1]  }
   0xa   :  { %11 = vrot.lane.b32.xlu0 %v10_v1, %s36_s0  ;;  %23 = vrot.lane.b32.xlu1 %v22_v2, %s37_s8  ;;  %v16_v4 = vld [vmem:[#allocation1 + $0x2] sm:$0x1]   ;;  %8 = vst.msk [vmem:[#allocation0] sm:$0x1] %vm7_vm0, %v6_v3  }
   0xe   :  { %17 = vrot.lane.b32.xlu0 %v16_v4, %s38_s9 }
  0x7c   :  { %v12_v5 = vpop.permute.xlu0 %11   ;;  %v24_v6 = vpop.permute.xlu1 %23  }
  0x7d   :  { %14 = vst.msk [vmem:[#allocation0] sm:$0x1] %vm13_vm1, %v12_v5  }
  0x80   :  { %v18_v7 = vpop.permute.xlu0 %17  }
  0x81   :  { %20 = vst.msk [vmem:[#allocation0] sm:$0x1] %vm19_vm2, %v18_v7  }
  0x82   :  { %26 = vst.msk [vmem:[#allocation0] sm:$0x1] %vm25_vm3, %v24_v6  }
  0x89   :  { %v30_v8 = vld [vmem:[#allocation0] sm:$0x1] }
  0x8a   :  { %32 = vst [vmem:[%s56_s1] sm:$0x1] %v30_v8 }

// kernel: tile.38
= control target key start
LH: loop header
LB: loop body
LE: loop exit
PB: predicated region body
PF: predicated region fallthrough
CT: control target
= control target key end

     0   :  { %s22_s0 = inlined_call_operand.vmem [shape: f32[16], index: 0, kind: input, shape index: {}]   ;;  %s23_s1 = inlined_call_operand.vmem [shape: f32[2,16], index: 1, kind: output, shape index: {}]  }
   0x1   :  { %v4_v0 = vld [vmem:[%s22_s0] ss:$0 sm:$0xff] }
   0x2   :  { %5 = vst [vmem:[%s23_s1] sm:$0x3] %v4_v0 }

// kernel: tile.39
= control target key start
LH: loop header
LB: loop body
LE: loop exit
PB: predicated region body
PF: predicated region fallthrough
CT: control target
= control target key end

     0   :  { %vm7_vm0 = vcmask 130048   ;;  %vm13_vm1 = vcmask 261248   ;;  %s39_s0 = inlined_call_operand.vmem [shape: f32[2,16], index: 0, kind: input, shape index: {}]   ;;  %s40_s1 = inlined_call_operand.vmem [shape: f32[1,32], index: 1, kind: output, shape index: {}]  }
   0x1   :  { %v4_v0 = vld [vmem:[%s39_s0] sm:$0x3]  ;;  %s22_s0 = smov 16  }
   0x2   :  { %5 = vst [vmem:[#allocation1] sm:$0x3] %v4_v0 }
   0x9   :  { %v10_v1 = vld [vmem:[#allocation1 + $0x1] sm:$0x1]   ;;  %v6_v2 = vld [vmem:[#allocation1] sm:$0x1]  }
   0xa   :  { %11 = vrot.lane.b32.xlu0 %v10_v1, %s22_s0  ;;  %8 = vst.msk [vmem:[#allocation0] sm:$0x1] %vm7_vm0, %v6_v2  }
  0x7c   :  { %v12_v3 = vpop.permute.xlu0 %11  }
  0x7d   :  { %14 = vst.msk [vmem:[#allocation0] sm:$0x1] %vm13_vm1, %v12_v3  }
  0x84   :  { %v18_v4 = vld [vmem:[#allocation0] sm:$0x1] }
  0x85   :  { %20 = vst [vmem:[%s40_s1] sm:$0x1] %v18_v4 }

// kernel: dis_std_forward.1
= control target key start
LH: loop header
LB: loop body
LE: loop exit
PB: predicated region body
PF: predicated region fallthrough
CT: control target
= control target key end

     0   :  { %s4558_s0 = inlined_call_operand.vmem [shape: bf16[2,16,64], index: 0, kind: input, shape index: {}]   ;;  %s4559_s1 = inlined_call_operand.vmem [shape: bf16[4,8,16], index: 1, kind: input, shape index: {}]   ;;  %s4560_s2 = inlined_call_operand.vmem [shape: bf16[4,64,64], index: 2, kind: input, shape index: {}]   ;;  %s4561_s3 = inlined_call_operand.vmem [shape: f32[1,64], index: 3, kind: input, shape index: {}]   ;;  %s4562_s4 = inlined_call_operand.vmem [shape: bf16[4,4,8], index: 4, kind: input, shape index: {}, may-alias: {4,11}]   ;;  %s4563_s5 = inlined_call_operand.vmem [shape: bf16[4,64,64], index: 5, kind: input, shape index: {}]   ;;  %s4564_s6 = inlined_call_operand.vmem [shape: f32[1,64], index: 6, kind: input, shape index: {}]   ;;  %s4565_s7 = inlined_call_operand.vmem [shape: f32[64,4], index: 7, kind: input, shape index: {}]   ;;  %s4566_s8 = inlined_call_operand.<no memory space> [shape: f32[1,1], index: 8, kind: input, shape index: {}]   ;;  %s4567_s9 = inlined_call_operand.vmem [shape: f32[8,16], index: 9, kind: input, shape index: {}]   ;;  %s4568_s10 = inlined_call_operand.vmem [shape: f32[64,32], index: 10, kind: input, shape index: {}]   ;;  %s4569_s11 = inlined_call_operand.vmem [shape: bf16[4,4,8], index: 11, kind: input, shape index: {}, may-alias: {4,11}]   ;;  %s4570_s12 = inlined_call_operand.vmem [shape: bf16[4,32,32], index: 12, kind: input, shape index: {}]   ;;  %s4571_s13 = inlined_call_operand.vmem [shape: f32[1,32], index: 13, kind: input, shape index: {}]   ;;  %s4572_s14 = inlined_call_operand.vmem [shape: bf16[4,2,4], index: 14, kind: input, shape index: {}]   ;;  %s4573_s15 = inlined_call_operand.vmem [shape: bf16[4,32,32], index: 15, kind: input, shape index: {}]   ;;  %s4574_s16 = inlined_call_operand.vmem [shape: f32[1,32], index: 16, kind: input, shape index: {}]   ;;  %s4575_s17 = inlined_call_operand.vmem [shape: f32[32,2], index: 17, kind: input, shape index: {}]   ;;  %s4576_s19 = inlined_call_operand.hbm [shape: f32[2,4,4], index: 19, kind: output, shape index: {0}]   ;;  %s4577_s20 = inlined_call_operand.hbm [shape: f32[2,2,2], index: 20, kind: output, shape index: {1}]   ;;  %s4578_s18 = inlined_call_operand.<no memory space> [shape: f32[1,1], index: 18, kind: input, shape index: {}]  }
   0x1   :  { %4589 = sst [smem:[#allocation16_spill]] %s4558_s0  ;;  %v26_v0 = vstv %s4566_s8  ;;  %v28_v1 = vstv %s4578_s18 }
   0x2   :  { %4590 = sst [smem:[#allocation17_spill]] %s4559_s1  ;;  %27 = vst [vmem:[#allocation2] sm:$0x1] %v26_v0  ;;  %29 = vst [vmem:[#allocation3] sm:$0x1] %v28_v1 }
   0x3   :  { %4591 = sst [smem:[#allocation18_spill]] %s4560_s2 }
   0x4   :  { %4592 = sst [smem:[#allocation19_spill]] %s4561_s3 }
   0x5   :  { %4593 = sst [smem:[#allocation20_spill]] %s4562_s4 }
   0x6   :  { %4594 = sst [smem:[#allocation21_spill]] %s4577_s20 }
   0x7   :  { %30 = vsyncpa [#allocation5], 0 }
   0x8   :  { %32 = vsyncpa [#allocation5 + $0x1], 0 }
   0x9   :  { %33 = vsyncpa [#allocation7], 0 }
   0xa   :  { %35 = vsyncpa [#allocation7 + $0x1], 0  ;;  %s3966_s2 = smov 0   ;;  %s3968_s25 = smov 0  }
   0xb   :  { %s3970_s3 = smov 0   ;;  %s3972_s26 = smov 0  }
   0xc LB: > { %4595 = sst [smem:[#allocation10_spill]] %s3835_s2  ;;  %s3987_s8 = sadd.s32 4294967295, %s3847_s26   ;;  %s3847_s26 = sphi %s3972_s26, %s4613_s26   ;;  %s3843_s3 = sphi %s3970_s3, %s4615_s3   ;;  %s3839_s25 = sphi %s3968_s25, %s4617_s25   ;;  %s3835_s2 = sphi %s3966_s2, %s4616_s2  }
   0xd   : > { %4596 = sst [smem:[#allocation11_spill]] %s3843_s3  ;;  %s2997_s18 = sadd.s32 4294967294, %s3847_s26  }
   0xe   : > { %4597 = sst [smem:[#allocation12_spill]] %s3847_s26  ;;  %s3991_s27 = sadd.s32 1, %s3847_s26  }
   0xf   : > { %4598 = sst [smem:[#allocation13_spill]] %s3991_s27  ;;  %s452_s28 = sadd.s32 1, %s3843_s3 }
  0x10   : > { %s449_s4 = ssub.s32 %s3847_s26, %s3991_s27  ;;  %p462_p0 = scmp.ne.s32.totalorder %s3843_s3, %s3839_s25 }
  0x11   : > { %p450_p1 = scmp.eq.s32.totalorder %s449_s4, 0  ;;  %p463_p2 = scmp.eq.s32.totalorder %s3987_s8, 1 }
  0x12   : > { %p468_p3 = scmp.ne.s32.totalorder %s3839_s25, %s3835_s2  ;;  %p469_p4 = scmp.eq.s32.totalorder %s2997_s18, 1 }
  0x13   : > { %s4002_s29 = scalar_select %p450_p1, %s3843_s3, %s452_s28  }
  0x14   : > { %p4004_p5 = por %p463_p2, %p462_p0  ;;  %p4008_p6 = por %p469_p4, %p468_p3 }
  0x15   : > { %4599 = sst [smem:[#allocation14_spill]] %s4002_s29  ;;  %p3000_p7 = scmp.ge.s32.totalorder %s3847_s26, 1 }
  0x16   : > { %s4601_s0 = scalar_select %p4008_p6, 1, 0 }
  0x17   : > { %p575_p8 = scmp.lt.s32.totalorder %s3847_s26, 3 }
  0x18   : > { %4602 = sst [smem:[#allocation15_spill]] %s4601_s0 }
  0x19   : > { %p576_p9 = pnand %p3000_p7, %p575_p8 }
  0x1a   : > { %p638_p10 = scmp.lt.s32.totalorder (!%p576_p9), %s3987_s8, 1  ;;  %v3849_v2 = vmov (!%p576_p9), 0.0   ;;  %vm3850_vm0 = vmmov (!%p576_p9), 0   ;;  %s4603_s24 = sld [smem:[#allocation16_spill]] (!%p576_p9)  ;;  %vm653_vm1 = vcmask (!%p576_p9), 130048   ;;  %vm785_vm2 = vcmask (!%p576_p9), 523264  }
  0x1b   : > { %579 = sbr.rel (%p576_p9) target bundleno = 3388 (0xd3c), region = 96  ;;  %3309 = vmatprep.subr.bf16.mxu0 (!%p576_p9), %v3849_v2  ;;  %3315 = vmatprep.subr.bf16.mxu1 (!%p576_p9), %v3849_v2  ;;  %s4604_s29 = sld [smem:[#allocation17_spill]] (!%p576_p9)  ;;  %v3723_v53 = vld [vmem:[%s4563_s5 + $0x20] sm:$0xff] (!%p576_p9)   ;;  %v3725_v54 = vld [vmem:[%s4563_s5 + $0x28] sm:$0xff] (!%p576_p9)   ;;  %vm1158_vm3 = vcmask (!%p576_p9), 1043456   ;;  %vm1154_vm4 = vcmask (!%p576_p9), 64512  }
  0x1c   : > { %3311 = vmatprep.mubr.msk.bf16.mxu0 (!%p576_p9), %vm3850_vm0, %v3849_v2  ;;  %3317 = vmatprep.mubr.msk.bf16.mxu1 (!%p576_p9), %vm3850_vm0, %v3849_v2  ;;  %s4605_s26 = sld [smem:[#allocation18_spill]] (!%p576_p9)  ;;  %s4608_s27 = sld [smem:[#allocation20_spill]] (!%p576_p9)  ;;  %vm1747_vm5 = vcmask (!%p576_p9), 27648   ;;  %vm2022_vm6 = vcmask (!%p576_p9), 261120   ;;  %vm2351_vm7 = vcmask (!%p576_p9), 1041408   ;;  %vm2347_vm8 = vcmask (!%p576_p9), 31744  }
  0x1d   : > { %s4314_s22 = sand.u32 (!%p576_p9), 1, %s3839_s25  }
  0x1e   : > { %s3001_s3 = sshll.u32 (!%p576_p9), %s4314_s22, 2  ;;  %s2875_s28 = scalar_lea.sflag (!%p576_p9), [#allocation5], %s4314_s22 }
  0x1f   : > { %s4317_s2 = scalar_lea.vmem (!%p576_p9), [#allocation4], %s3001_s3 }
  0x21   : > { %v646_v4 = vld [vmem:[%s4604_s29] sm:$0xf] (!%p576_p9)  ;;  %v3007_v5 = vld [vmem:[%s4604_s29 + $0x4] sm:$0xf] (!%p576_p9)  ;;  %v3027_v25 = vld [vmem:[%s4604_s29 + $0x8] sm:$0xf] (!%p576_p9) }
  0x22   : > { %s639_s21 = scalar_select %p638_p10, %s3987_s8, 1  ;;  %v3705_v6 = vld [vmem:[%s4605_s26 + $0x20] sm:$0xff]   ;;  %v3042_v26 = vld [vmem:[%s4604_s29 + $0xc] sm:$0xf] }
  0x23   : > { %s4606_s20 = smov %s4605_s26  ;;  %s3182_s26 = sshll.u32 %s3987_s8, 6 }
  0x24   : > { %s3186_s1 = sshll.u32 %s639_s21, 3  ;;  %v3706_v7 = vld [vmem:[%s4606_s20] sm:$0xff]   ;;  %v3707_v8 = vld [vmem:[%s4606_s20 + $0x28] sm:$0xff]   ;;  %v3709_v10 = vld [vmem:[%s4606_s20 + $0x30] sm:$0xff]   ;;  %s3853_s21 = smov [#allocation4]  }
  0x25   : > { %s642_s18 = scalar_lea.vmem %s4603_s24, %s3186_s1  ;;  %v3708_v9 = vld [vmem:[%s4606_s20 + $0x8] sm:$0xff]   ;;  %v3710_v11 = vld [vmem:[%s4606_s20 + $0x10] sm:$0xff]   ;;  %v3711_v12 = vld [vmem:[%s4606_s20 + $0x38] sm:$0xff]   ;;  %s4607_s1 = sld [smem:[#allocation19_spill]] }
  0x26   : > { %v4025_v3 = vld [vmem:[%s642_s18] sm:$0xff]   ;;  %v3712_v13 = vld [vmem:[%s4606_s20 + $0x18] sm:$0xff]   ;;  %v3714_v27 = vld [vmem:[%s4606_s20 + $0x48] sm:$0xff]   ;;  %s4489_s24 = scalar_lea.hbm %s4576_s19, %s3182_s26  ;;  %s2893_s18 = sshll.u32 %s4317_s2, 4  ;;  %s2894_s18 = int_to_ptr.vmem [resolvable:$true] %s2893_s18 }
  0x27   : > { %3310 = vmatpush3.bf16.msra.mxu0 %v4025_v3  ;;  %3316 = vmatpush3.bf16.msra.mxu1 %v4025_v3  ;;  %v3713_v20 = vld [vmem:[%s4606_s20 + $0x40] sm:$0xff]   ;;  %v3715_v28 = vld [vmem:[%s4606_s20 + $0x50] sm:$0xff]   ;;  %v3717_v30 = vld [vmem:[%s4606_s20 + $0x58] sm:$0xff]   ;;  %s3753_s4 = scalar_lea.vmem %s2894_s18, 64 }
  0x28   : > { %3321 = vmatprep.subr.bf16.mxu0 %v3849_v2  ;;  %3333 = vmatprep.subr.bf16.mxu1 %v3849_v2  ;;  %v3716_v29 = vld [vmem:[%s4606_s20 + $0x60] sm:$0xff]   ;;  %v3718_v31 = vld [vmem:[%s4606_s20 + $0x68] sm:$0xff]   ;;  %v3719_v32 = vld [vmem:[%s4606_s20 + $0x70] sm:$0xff]   ;;  %p3754_p11 = scmp.ne.s32.totalorder %s2894_s18, %s3753_s4 }
  0x29   : > { %v3720_v33 = vld [vmem:[%s4606_s20 + $0x78] sm:$0xff]  }
  0x2a   : > { %3312 = vmatmul.mubr.msk.bf16.vlgmr.msra.gmra.mrb[0].mxu0 %vm653_vm1, %v646_v4  ;;  %3318 = vmatmul.mubr.msk.bf16.vlgmr.msra.gmra.mrb[0].mxu1 %vm653_vm1, %v3007_v5  ;;  %p3755_p12 = pnand %p3754_p11, %p4004_p5 }
  0x2b   : > { %3322 = vmatpush3.bf16.msra.mxu0 %v3705_v6  ;;  %3334 = vmatpush3.bf16.msra.mxu1 %v3706_v7  ;;  %v3057_v61 = vld [vmem:[%s4607_s1] ss:$0 sm:$0xff]  ;;  %s3757_s1 = sshll.u32 %s3853_s21, 4  ;;  %s3758_s1 = int_to_ptr.vmem [resolvable:$false] %s3757_s1 }
  0x2c   : > { %3323 = vmatprep.subr.bf16.mxu0 %v3849_v2  ;;  %3335 = vmatprep.subr.bf16.mxu1 %v3849_v2  ;;  %p3756_p13 = pneg %p3755_p12  ;;  %s3759_s3 = scalar_lea.vmem %s3758_s1, 128 }
  0x2d   : > { %3329 = vmatprep.mubr.msk.bf16.mxu0 %vm3850_vm0, %v3849_v2  ;;  %3341 = vmatprep.mubr.msk.bf16.mxu1 %vm3850_vm0, %v3849_v2  ;;  %p3760_p0 = scmp.lt.s32.totalorder %s2894_s18, %s3758_s1  ;;  %p3761_p1 = scmp.lt.s32.totalorder %s3759_s3, %s3753_s4 }
  0x2f   : > { %3324 = vmatpush3.bf16.msra.mxu0 %v3707_v8  ;;  %3336 = vmatpush3.bf16.msra.mxu1 %v3708_v9  ;;  %v1153_v9 = vld [vmem:[%s4608_s27] sm:$0x3]  ;;  %p3762_p2 = por %p3761_p1, %p3760_p0 }
  0x30   : > { %3325 = vmatprep.subr.bf16.mxu0 %v3849_v2  ;;  %3337 = vmatprep.subr.bf16.mxu1 %v3849_v2 }
  0x31   : > { %p3763_p3 = pnand %p3762_p2, %p3756_p13 }
  0x33   : > { %3326 = vmatpush3.bf16.msra.mxu0 %v3709_v10  ;;  %3338 = vmatpush3.bf16.msra.mxu1 %v3710_v11  ;;  %v3059_v10 = vld [vmem:[%s4608_s27 + $0x2] sm:$0x3] }
  0x34   : > { %3327 = vmatprep.subr.bf16.mxu0 %v3849_v2  ;;  %3339 = vmatprep.subr.bf16.mxu1 %v3849_v2  ;;  %v3721_v11 = vld [vmem:[%s4563_s5] sm:$0xff]  }
  0x37   : > { %3328 = vmatpush3.bf16.msra.mxu0 %v3711_v12  ;;  %3340 = vmatpush3.bf16.msra.mxu1 %v3712_v13  ;;  %v3722_v12 = vld [vmem:[%s4563_s5 + $0x8] sm:$0xff]   ;;  %v3724_v13 = vld [vmem:[%s4563_s5 + $0x10] sm:$0xff]  }
  0x38   : > { %3345 = vmatprep.subr.bf16.mxu0 %v3849_v2  ;;  %3351 = vmatprep.subr.bf16.mxu1 %v3849_v2 }
  0xfd   : > { %v691_v14 = vpop.f32.mrb[0].mxu0  ;;  %v745_v15 = vpop.f32.mrb[0].mxu1 }
  0xfe   : > { %v697_v16 = vpack.c.bf16 %v691_v14, %v691_v14  ;;  %v751_v17 = vpack.c.bf16 %v745_v15, %v745_v15  ;;  %v3319_v18 = vpop.f32.mrb[1].mxu1  ;;  %v3313_v19 = vpop.f32.mrb[1].mxu0  ;;  %v3726_v14 = vld [vmem:[%s4563_s5 + $0x18] sm:$0xff]   ;;  %v3727_v15 = vld [vmem:[%s4563_s5 + $0x30] sm:$0xff]  }
  0xff   : > { %v748_v21 = vpop.f32.mrb[2].mxu1  ;;  %v694_v22 = vpop.f32.mrb[2].mxu0 }
 0x100   : > { %v3320_v23 = vpop.f32.mrb[3].mxu1  ;;  %3330 = vmatmul.mubr.msk.bf16.vlgmr.msra.gmra.mrb[4].mxu0 %vm785_vm2, %v751_v17  ;;  %3342 = vmatmul.mubr.msk.bf16.vlgmr.msra.gmra.mrb[4].mxu1 %vm785_vm2, %v697_v16  ;;  %v3314_v24 = vpop.f32.mrb[3].mxu0  ;;  %v3728_v16 = vld [vmem:[%s4563_s5 + $0x38] sm:$0xff]  }
 0x101   : > { %3346 = vmatpush3.bf16.msra.mxu0 %v4025_v3  ;;  %3347 = vmatprep.mubr.msk.bf16.mxu0 %vm3850_vm0, %v3849_v2 }
 0x102   : > { %3363 = vmatprep.subr.bf16.mxu0 %v3849_v2  ;;  %3352 = vmatpush3.bf16.msra.mxu1 %v3713_v20 }
 0x103   : > { %3353 = vmatprep.subr.bf16.mxu1 %v3849_v2  ;;  %3359 = vmatprep.mubr.msk.bf16.mxu1 %vm3850_vm0, %v3849_v2 }
 0x106   : > { %3354 = vmatpush3.bf16.msra.mxu1 %v3714_v27  ;;  %v3079_v27 = vld [vmem:[%s4608_s27 + $0x4] sm:$0x3] }
 0x107   : > { %3355 = vmatprep.subr.bf16.mxu1 %v3849_v2 }
 0x108   : > { %3348 = vmatmul.mubr.msk.bf16.vlgmr.msra.gmra.mrb[8].mxu0 %vm653_vm1, %v3027_v25 }
 0x109   : > { %3364 = vmatpush3.bf16.msra.mxu0 %v4025_v3  ;;  %3365 = vmatprep.mubr.msk.bf16.mxu0 %vm3850_vm0, %v3849_v2 }
 0x10a   : > { %3369 = vmatprep.subr.bf16.mxu0 %v3849_v2  ;;  %3356 = vmatpush3.bf16.msra.mxu1 %v3715_v28  ;;  %v3094_v28 = vld [vmem:[%s4608_s27 + $0x6] sm:$0x3] }
 0x10b   : > { %3357 = vmatprep.subr.bf16.mxu1 %v3849_v2 }
 0x10e   : > { %3358 = vmatpush3.bf16.msra.mxu1 %v3717_v30  ;;  %v3730_v30 = vld [vmem:[%s4563_s5 + $0x48] sm:$0xff]  }
 0x10f   : > { %3381 = vmatprep.subr.bf16.mxu1 %v3849_v2 }
 0x110   : > { %3366 = vmatmul.mubr.msk.bf16.vlgmr.msra.gmra.mrb[12].mxu0 %vm653_vm1, %v3042_v26 }
 0x111   : > { %3377 = vmatprep.mubr.msk.bf16.mxu0 %vm3850_vm0, %v3849_v2  ;;  %3370 = vmatpush3.bf16.msra.mxu0 %v3716_v29  ;;  %v3729_v29 = vld [vmem:[%s4563_s5 + $0x40] sm:$0xff]  }
 0x112   : > { %3371 = vmatprep.subr.bf16.mxu0 %v3849_v2 }
 0x115   : > { %3372 = vmatpush3.bf16.msra.mxu0 %v3718_v31  ;;  %v3731_v31 = vld [vmem:[%s4563_s5 + $0x50] sm:$0xff]  }
 0x116   : > { %3373 = vmatprep.subr.bf16.mxu0 %v3849_v2 }
 0x119   : > { %3374 = vmatpush3.bf16.msra.mxu0 %v3719_v32  ;;  %v3732_v32 = vld [vmem:[%s4563_s5 + $0x60] sm:$0xff]  }
 0x11a   : > { %3375 = vmatprep.subr.bf16.mxu0 %v3849_v2 }
 0x11d   : > { %3376 = vmatpush3.bf16.msra.mxu0 %v3720_v33  ;;  %v3733_v33 = vld [vmem:[%s4563_s5 + $0x58] sm:$0xff]  }
 0x11e   : > { %3393 = vmatprep.subr.bf16.mxu0 %v3849_v2 }
 0x1d3   : > { %v823_v34 = vpop.f32.mrb[4].mxu0  ;;  %v890_v35 = vpop.f32.mrb[4].mxu1 }
 0x1d4   : > { %v891_v36 = vadd.f32 %v890_v35, %v823_v34  ;;  %v3331_v37 = vpop.f32.mrb[5].mxu0  ;;  %v3343_v38 = vpop.f32.mrb[5].mxu1  ;;  %v3734_v34 = vld [vmem:[%s4563_s5 + $0x68] sm:$0xff]   ;;  %v3735_v35 = vld [vmem:[%s4563_s5 + $0x70] sm:$0xff]  }
 0x1d5   : > { %v826_v39 = vpop.f32.mrb[6].mxu0  ;;  %v893_v40 = vpop.f32.mrb[6].mxu1 }
 0x1d6   : > { %v3332_v41 = vpop.f32.mrb[7].mxu0  ;;  %v3344_v42 = vpop.f32.mrb[7].mxu1 }
 0x1db   : > { %v935_v43 = vpop.f32.mrb[8].mxu0 }
 0x1dc   : > { %v941_v44 = vpack.c.bf16 %v935_v43, %v935_v43  ;;  %v3349_v45 = vpop.f32.mrb[9].mxu0 }
 0x1dd   : > { %v938_v46 = vpop.f32.mrb[10].mxu0 }
 0x1de   : > { %v3350_v47 = vpop.f32.mrb[11].mxu0  ;;  %3360 = vmatmul.mubr.msk.bf16.vlgmr.msra.gmra.mrb[8].mxu1 %vm785_vm2, %v941_v44 }
 0x1df   : > { %3383 = vmatprep.mubr.msk.bf16.mxu1 %vm3850_vm0, %v3849_v2 }
 0x1e3   : > { %v1058_v48 = vpop.f32.mrb[12].mxu0 }
 0x1e4   : > { %v1064_v49 = vpack.c.bf16 %v1058_v48, %v1058_v48  ;;  %v3367_v50 = vpop.f32.mrb[13].mxu0 }
 0x1e5   : > { %v1061_v51 = vpop.f32.mrb[14].mxu0 }
 0x1e6   : > { %v3368_v52 = vpop.f32.mrb[15].mxu0  ;;  %3378 = vmatmul.mubr.msk.bf16.vlgmr.msra.gmra.mrb[16].mxu0 %vm785_vm2, %v1064_v49 }
 0x1e7   : > { %3401 = vmatprep.mubr.msk.bf16.mxu0 %vm3850_vm0, %v3849_v2  ;;  %3394 = vmatpush3.bf16.msra.mxu0 %v3723_v53 }
 0x1e8   : > { %3395 = vmatprep.subr.bf16.mxu0 %v3849_v2 }
 0x1eb   : > { %3396 = vmatpush3.bf16.msra.mxu0 %v3725_v54 }
 0x1ec   : > { %3397 = vmatprep.subr.bf16.mxu0 %v3849_v2 }
 0x1ef   : > { %3398 = vmatpush3.bf16.msra.mxu0 %v3727_v15  ;;  %v1829_v15 = vld [vmem:[%s4568_s10 + $0x20] sm:$0xff] }
 0x1f0   : > { %3399 = vmatprep.subr.bf16.mxu0 %v3849_v2 }
 0x1f3   : > { %3400 = vmatpush3.bf16.msra.mxu0 %v3728_v16  ;;  %v1830_v16 = vld [vmem:[%s4568_s10 + $0x28] sm:$0xff] }
 0x1f4   : > { %3417 = vmatprep.subr.bf16.mxu0 %v3849_v2 }
 0x2b1   : > { %v1012_v55 = vpop.f32.mrb[8].mxu1 }
 0x2b2   : > { %v1018_v56 = vadd.f32 %v1012_v55, %v891_v36  ;;  %v3361_v57 = vpop.f32.mrb[9].mxu1  ;;  %v3736_v36 = vld [vmem:[%s4563_s5 + $0x78] sm:$0xff]  }
 0x2b3   : > { %v1015_v58 = vpop.f32.mrb[10].mxu1  ;;  %v1657_v57 = vld [vmem:[%s4565_s7 + $0x8] sm:$0xff] }
 0x2b4   : > { %v3362_v59 = vpop.f32.mrb[11].mxu1 }
 0x2b5   : > { %v3851_v59 = vmov 0.0|0.0  }
 0x2b9   : > { %v1135_v60 = vpop.f32.mrb[16].mxu0 }
 0x2ba   : > { %v1141_v62 = vadd.f32 %v1135_v60, %v1018_v56  ;;  %v3379_v63 = vpop.f32.mrb[17].mxu0  ;;  %v1656_v56 = vld [vmem:[%s4565_s7] sm:$0xff]  ;;  %v1658_v60 = vld [vmem:[%s4565_s7 + $0x10] sm:$0xff] }
 0x2bb   : > { %v1138_v0 = vpop.f32.mrb[18].mxu0  ;;  %v3622_v58 = vpack.c.bf16 %v1657_v57, %v1656_v56  ;;  %v1660_v63 = vld [vmem:[%s4565_s7 + $0x20] sm:$0xff] }
 0x2bc   : > { %v1149_v1 = vadd.f32 %v3057_v61, %v1141_v62  ;;  %v3380_v4 = vpop.f32.mrb[19].mxu0  ;;  %v1659_v61 = vld [vmem:[%s4565_s7 + $0x18] sm:$0xff]  ;;  %v1661_v0 = vld [vmem:[%s4565_s7 + $0x28] sm:$0xff] }
 0x2bd   : > { %v3625_v62 = vpack.c.bf16 %v1659_v61, %v1658_v60  ;;  %v1662_v4 = vld [vmem:[%s4565_s7 + $0x30] sm:$0xff] }
 0x2be   : > { %v1150_v5 = vmul.f32 0.2, %v1149_v1 }
 0x2c0   : > { %v1151_v6 = vmax.f32 %v1149_v1, %v1150_v5  ;;  %v3628_v1 = vpack.c.bf16 %v1661_v0, %v1660_v63  ;;  %v1663_v5 = vld [vmem:[%s4565_s7 + $0x38] sm:$0xff]  ;;  %v3136_v63 = vld [vmem:[%s4569_s11 + $0x6] sm:$0x3] }
 0x2c1   : > { %v3741_v0 = vld [vmem:[%s4570_s12 + $0x20] sm:$0xff]  }
 0x2c2   : > { %v1152_v7 = vpack.c.bf16 %v1151_v6, %v1151_v6  ;;  %v3631_v6 = vpack.c.bf16 %v1663_v5, %v1662_v4 }
 0x2c4   : > { %v1160_v8 = vsel %vm1158_vm3, %v1152_v7, 0  ;;  %v3110_v7 = vld [vmem:[#allocation2] ss:$0 sm:$0xff] }
 0x2c5   : > { %3382 = vmatpush3.bf16.msra.mxu1 %v1160_v8 }
 0x2c6   : > { %3387 = vmatprep.subr.bf16.mxu1 %v3849_v2 }
 0x2c8   : > { %3384 = vmatmul.mubr.msk.bf16.vlgmr.msra.gmra.mrb[12].mxu1 %vm1154_vm4, %v1153_v9  ;;  %v1826_v9 = vld [vmem:[%s4568_s10 + $0x8] sm:$0xff] }
 0x2c9   : > { %3388 = vmatpush3.bf16.msra.mxu1 %v1160_v8  ;;  %3389 = vmatprep.mubr.msk.bf16.mxu1 %vm3850_vm0, %v3849_v2 }
 0x2ca   : > { %3405 = vmatprep.subr.bf16.mxu1 %v3849_v2 }
 0x2d0   : > { %3390 = vmatmul.mubr.msk.bf16.vlgmr.msra.gmra.mrb[16].mxu1 %vm1154_vm4, %v3059_v10  ;;  %v3852_v10 = vmov 0  }
 0x2d1   : > { %3406 = vmatpush3.bf16.msra.mxu1 %v3721_v11  ;;  %3413 = vmatprep.mubr.msk.bf16.mxu1 %vm3850_vm0, %v3849_v2 }
 0x2d2   : > { %3407 = vmatprep.subr.bf16.mxu1 %v3849_v2  ;;  %3703 = vset.pattern.permute.xlu0 %v3852_v10 }
 0x2d3   : > { %1671 = vperm.xlu0 %3703, %v3110_v7  }
 0x2d5   : > { %3408 = vmatpush3.bf16.msra.mxu1 %v3722_v12  ;;  %v1827_v12 = vld [vmem:[%s4568_s10 + $0x10] sm:$0xff] }
 0x2d6   : > { %3409 = vmatprep.subr.bf16.mxu1 %v3849_v2 }
 0x2d9   : > { %3410 = vmatpush3.bf16.msra.mxu1 %v3724_v13  ;;  %v1828_v13 = vld [vmem:[%s4568_s10 + $0x18] sm:$0xff] }
 0x2da   : > { %3411 = vmatprep.subr.bf16.mxu1 %v3849_v2 }
 0x2dd   : > { %3412 = vmatpush3.bf16.msra.mxu1 %v3726_v14  ;;  %v3640_v14 = vpack.c.bf16 %v1828_v13, %v1827_v12 }
 0x2de   : > { %3423 = vmatprep.subr.bf16.mxu1 %v3849_v2 }
 0x39b   : > { %v1196_v17 = vpop.f32.mrb[12].mxu1 }
 0x39c   : > { %v1202_v18 = vpack.c.bf16 %v1196_v17, %v1196_v17  ;;  %v3385_v19 = vpop.f32.mrb[13].mxu1  ;;  %v3643_v17 = vpack.c.bf16 %v1830_v16, %v1829_v15 }
 0x39d   : > { %v1199_v20 = vpop.f32.mrb[14].mxu1 }
 0x39e   : > { %v3386_v21 = vpop.f32.mrb[15].mxu1  ;;  %3414 = vmatmul.mubr.msk.bf16.vlgmr.msra.gmra.mrb[20].mxu1 %vm785_vm2, %v1202_v18 }
 0x39f   : > { %3431 = vmatprep.mubr.msk.bf16.mxu1 %vm3850_vm0, %v3849_v2  ;;  %3424 = vmatpush3.bf16.msra.mxu1 %v3729_v29 }
 0x3a0   : > { %3425 = vmatprep.subr.bf16.mxu1 %v3849_v2 }
 0x3a3   : > { %v1250_v22 = vpop.f32.mrb[16].mxu1  ;;  %3426 = vmatpush3.bf16.msra.mxu1 %v3730_v30 }
 0x3a4   : > { %v1256_v23 = vpack.c.bf16 %v1250_v22, %v1250_v22  ;;  %v3391_v24 = vpop.f32.mrb[17].mxu1  ;;  %3427 = vmatprep.subr.bf16.mxu1 %v3849_v2 }
 0x3a5   : > { %v1253_v25 = vpop.f32.mrb[18].mxu1  ;;  %v3109_v24 = vld [vmem:[%s4564_s6] ss:$0 sm:$0xff] }
 0x3a6   : > { %v3392_v26 = vpop.f32.mrb[19].mxu1  ;;  %3402 = vmatmul.mubr.msk.bf16.vlgmr.msra.gmra.mrb[20].mxu0 %vm785_vm2, %v1256_v23 }
 0x3a7   : > { %3418 = vmatpush3.bf16.msra.mxu0 %v1160_v8  ;;  %3419 = vmatprep.mubr.msk.bf16.mxu0 %vm3850_vm0, %v3849_v2 }
 0x3a8   : > { %3435 = vmatprep.subr.bf16.mxu0 %v3849_v2  ;;  %3428 = vmatpush3.bf16.msra.mxu1 %v3731_v31 }
 0x3a9   : > { %3429 = vmatprep.subr.bf16.mxu1 %v3849_v2 }
 0x3ac   : > { %3430 = vmatpush3.bf16.msra.mxu1 %v3733_v33  ;;  %v1831_v33 = vld [vmem:[%s4568_s10 + $0x30] sm:$0xff] }
 0x3ad   : > { %3621 = vmatprep.subr.bf16.mxu1 %v3851_v59 }
 0x3ae   : > { %3420 = vmatmul.mubr.msk.bf16.vlgmr.msra.gmra.mrb[24].mxu0 %vm1154_vm4, %v3079_v27 }
 0x3af   : > { %3436 = vmatpush3.bf16.msra.mxu0 %v1160_v8  ;;  %3437 = vmatprep.mubr.msk.bf16.mxu0 %vm3850_vm0, %v3849_v2  ;;  %v1825_v8 = vld [vmem:[%s4568_s10] sm:$0xff] }
 0x3b0   : > { %3441 = vmatprep.subr.bf16.mxu0 %v3849_v2  ;;  %v3637_v11 = vpack.c.bf16 %v1826_v9, %v1825_v8 }
 0x3b6   : > { %3438 = vmatmul.mubr.msk.bf16.vlgmr.msra.gmra.mrb[28].mxu0 %vm1154_vm4, %v3094_v28 }
 0x3b7   : > { %3449 = vmatprep.mubr.msk.bf16.mxu0 %vm3850_vm0, %v3849_v2  ;;  %3442 = vmatpush3.bf16.msra.mxu0 %v3732_v32  ;;  %v1749_v32 = vld [vmem:[%s4567_s9] sm:$0xff] }
 0x3b8   : > { %3443 = vmatprep.subr.bf16.mxu0 %v3849_v2 }
 0x3bb   : > { %3444 = vmatpush3.bf16.msra.mxu0 %v3734_v34 }
 0x3bc   : > { %3445 = vmatprep.subr.bf16.mxu0 %v3849_v2 }
 0x3bf   : > { %3446 = vmatpush3.bf16.msra.mxu0 %v3735_v35  ;;  %v1672_v35 = vpop.permute.xlu0 %1671 }
 0x3c0   : > { %3447 = vmatprep.subr.bf16.mxu0 %v3849_v2 }
 0x3c3   : > { %3448 = vmatpush3.bf16.msra.mxu0 %v3736_v36 }
 0x3c4   : > { %3636 = vmatprep.subr.bf16.mxu0 %v3851_v59 }
 0x471   : > { %v1394_v37 = vpop.f32.mrb[20].mxu1 }
 0x472   : > { %v3415_v38 = vpop.f32.mrb[21].mxu1 }
 0x473   : > { %v1397_v39 = vpop.f32.mrb[22].mxu1 }
 0x474   : > { %v3416_v40 = vpop.f32.mrb[23].mxu1 }
 0x479   : > { %v1327_v41 = vpop.f32.mrb[20].mxu0 }
 0x47a   : > { %v1395_v42 = vadd.f32 %v1394_v37, %v1327_v41  ;;  %v3403_v43 = vpop.f32.mrb[21].mxu0 }
 0x47b   : > { %v1330_v44 = vpop.f32.mrb[22].mxu0 }
 0x47c   : > { %v3404_v45 = vpop.f32.mrb[23].mxu0 }
 0x47d   : > { %v1907_v45 = vld [vmem:[%s4569_s11] sm:$0x3] }
 0x481   : > { %v1439_v46 = vpop.f32.mrb[24].mxu0 }
 0x482   : > { %v1445_v47 = vpack.c.bf16 %v1439_v46, %v1439_v46  ;;  %v3421_v48 = vpop.f32.mrb[25].mxu0  ;;  %v3115_v46 = vld [vmem:[%s4569_s11 + $0x2] sm:$0x3] }
 0x483   : > { %v1442_v49 = vpop.f32.mrb[26].mxu0  ;;  %v3738_v48 = vld [vmem:[%s4570_s12 + $0x8] sm:$0xff]  }
 0x484   : > { %v3422_v50 = vpop.f32.mrb[27].mxu0  ;;  %3432 = vmatmul.mubr.msk.bf16.vlgmr.msra.gmra.mrb[24].mxu1 %vm785_vm2, %v1445_v47  ;;  %v3737_v47 = vld [vmem:[%s4570_s12] sm:$0xff]   ;;  %v3739_v49 = vld [vmem:[%s4570_s12 + $0x10] sm:$0xff]  }
 0x485   : > { %3469 = vmatprep.mubr.msk.f32.mxu1 %vm3850_vm0, %v3849_v2  ;;  %3623 = vmatpush3.bf16.msra.mxu1 %v3622_v58  ;;  %v3740_v50 = vld [vmem:[%s4570_s12 + $0x18] sm:$0xff]  }
 0x486   : > { %3624 = vmatprep.subr.bf16.mxu1 %v3851_v59 }
 0x489   : > { %v1562_v51 = vpop.f32.mrb[28].mxu0  ;;  %3626 = vmatpush3.bf16.msra.mxu1 %v3625_v62  ;;  %v3127_v62 = vld [vmem:[%s4569_s11 + $0x4] sm:$0x3] }
 0x48a   : > { %v1568_v52 = vpack.c.bf16 %v1562_v51, %v1562_v51  ;;  %v3439_v53 = vpop.f32.mrb[29].mxu0  ;;  %3627 = vmatprep.subr.bf16.mxu1 %v3851_v59 }
 0x48b   : > { %v1565_v54 = vpop.f32.mrb[30].mxu0 }
 0x48c   : > { %v3440_v55 = vpop.f32.mrb[31].mxu0  ;;  %3450 = vmatmul.mubr.msk.bf16.vlgmr.msra.gmra.mrb[32].mxu0 %vm785_vm2, %v1568_v52 }
 0x48d   : > { %3495 = vmatprep.mubr.msk.f32.mxu0 %vm3850_vm0, %v3849_v2  ;;  %3629 = vmatpush3.bf16.msra.mxu1 %v3628_v1  ;;  %v3742_v1 = vld [vmem:[%s4570_s12 + $0x28] sm:$0xff]  }
 0x48e   : > { %3630 = vmatprep.subr.bf16.mxu1 %v3851_v59  ;;  %3638 = vmatpush3.bf16.msra.mxu0 %v3637_v11 }
 0x48f   : > { %3639 = vmatprep.subr.bf16.mxu0 %v3851_v59 }
 0x491   : > { %3632 = vmatpush3.bf16.msra.mxu1 %v3631_v6 }
 0x492   : > { %3633 = vmatprep.subr.bf16.mxu1 %v3851_v59  ;;  %3641 = vmatpush3.bf16.msra.mxu0 %v3640_v14  ;;  %v3743_v14 = vld [vmem:[%s4570_s12 + $0x30] sm:$0xff]  }
 0x493   : > { %3642 = vmatprep.subr.bf16.mxu0 %v3851_v59 }
 0x496   : > { %3644 = vmatpush3.bf16.msra.mxu0 %v3643_v17 }
 0x497   : > { %3645 = vmatprep.subr.bf16.mxu0 %v3851_v59 }
 0x557   : > { %v1516_v18 = vpop.f32.mrb[24].mxu1 }
 0x558   : > { %v1522_v19 = vadd.f32 %v1516_v18, %v1395_v42  ;;  %v3433_v20 = vpop.f32.mrb[25].mxu1 }
 0x559   : > { %v1519_v21 = vpop.f32.mrb[26].mxu1 }
 0x55a   : > { %v3434_v22 = vpop.f32.mrb[27].mxu1 }
 0x55f   : > { %v1639_v23 = vpop.f32.mrb[32].mxu0 }
 0x560   : > { %v1645_v25 = vadd.f32 %v1639_v23, %v1522_v19  ;;  %v3451_v26 = vpop.f32.mrb[33].mxu0  ;;  %v3744_v19 = vld [vmem:[%s4570_s12 + $0x38] sm:$0xff]  }
 0x561   : > { %v1642_v27 = vpop.f32.mrb[34].mxu0 }
 0x562   : > { %v1653_v28 = vadd.f32 %v3109_v24, %v1645_v25  ;;  %v3452_v29 = vpop.f32.mrb[35].mxu0 }
 0x564   : > { %v1654_v30 = vmul.f32 0.2, %v1653_v28 }
 0x566   : > { %v1655_v31 = vmax.f32 %v1653_v28, %v1654_v30 }
 0x568   : > { %3470 = vmatmul.mubr.msk.f32.vlgmr.msra.gmra.mrb[28].mxu1 %vm785_vm2, %v1655_v31  ;;  %v3145_v31 = vld [vmem:[%s4571_s13] ss:$0 sm:$0xff] }
 0x569   : > { %3635 = vmatpush3.bf16.msra.mxu1 %v4025_v3  ;;  %3476 = vmatprep.mubr.msk.f32.mxu1 %vm3850_vm0, %v3849_v2  ;;  %v1832_v3 = vld [vmem:[%s4568_s10 + $0x38] sm:$0xff] }
 0x56a   : > { %3498 = vmatprep.subr.bf16.mxu1 %v3849_v2  ;;  %v3646_v34 = vpack.c.bf16 %v1832_v3, %v1831_v33 }
 0x56c   : > { %3477 = vmatmul.mubr.msk.f32.vlgmr.msra.gmra.mrb[30].mxu1 %vm653_vm1, %v1749_v32  ;;  %3647 = vmatpush3.bf16.msra.mxu0 %v3646_v34 }
 0x56d   : > { %3500 = vmatprep.mubr.msk.bf16.mxu1 %vm3850_vm0, %v3849_v2  ;;  %3510 = vmatprep.subr.bf16.mxu0 %v3849_v2 }
 0x63b   : > { %v1743_v36 = vpop.f32.mrb[28].mxu1 }
 0x63c   : > { %v1744_v37 = vadd.f32 %v1743_v36, %v1672_v35  ;;  %v3471_v38 = vpop.f32.mrb[29].mxu1 }
 0x63e   : > { %1748 = vst.msk [vmem:[%s4317_s2] sm:$0xf] %vm1747_vm5, %v1744_v37 }
 0x63f   : > { %v1821_v39 = vpop.f32.mrb[30].mxu1 }
 0x640   : > { %v3478_v40 = vpop.f32.mrb[31].mxu1  ;;  %3496 = vmatmul.mubr.msk.f32.vlgmr.msra.gmra.mrb[36].mxu0 %vm785_vm2, %v1821_v39 }
 0x641   : > { %3514 = vmatprep.mubr.msk.bf16.mxu0 %vm3850_vm0, %v3849_v2  ;;  %3511 = vmatpush3.bf16.msra.mxu0 %v3739_v49  ;;  %v3147_v40 = vld [vmem:[%s4572_s14 + $0x1] sm:$0x1] }
 0x642   : > { %3512 = vmatprep.subr.bf16.mxu0 %v3849_v2 }
 0x645   : > { %3513 = vmatpush3.bf16.msra.mxu0 %v3740_v50 }
 0x646   : > { %3526 = vmatprep.subr.bf16.mxu0 %v3849_v2 }
 0x713   : > { %v1902_v41 = vpop.f32.mrb[36].mxu0 }
 0x714   : > { %v1906_v42 = vpack.c.bf16 %v1902_v41, %v1902_v41  ;;  %v3497_v43 = vpop.f32.mrb[37].mxu0  ;;  %v2346_v41 = vld [vmem:[%s4572_s14] sm:$0x1] }
 0x715   : > { %v3746_v43 = vld [vmem:[%s4573_s15 + $0x18] sm:$0xff]  }
 0x716   : > { %v1912_v44 = vsel %vm1158_vm3, %v1906_v42, 0  ;;  %v3745_v42 = vld [vmem:[%s4573_s15 + $0x10] sm:$0xff]  }
 0x717   : > { %3499 = vmatpush3.bf16.msra.mxu1 %v1912_v44 }
 0x718   : > { %3504 = vmatprep.subr.bf16.mxu1 %v3849_v2 }
 0x71a   : > { %3501 = vmatmul.mubr.msk.bf16.vlgmr.msra.gmra.mrb[32].mxu1 %vm1154_vm4, %v1907_v45  ;;  %v3748_v45 = vld [vmem:[%s4573_s15 + $0x8] sm:$0xff]  }
 0x71b   : > { %3505 = vmatpush3.bf16.msra.mxu1 %v1912_v44  ;;  %3506 = vmatprep.mubr.msk.bf16.mxu1 %vm3850_vm0, %v3849_v2 }
 0x71c   : > { %3518 = vmatprep.subr.bf16.mxu1 %v3849_v2 }
 0x722   : > { %3507 = vmatmul.mubr.msk.bf16.vlgmr.msra.gmra.mrb[36].mxu1 %vm1154_vm4, %v3115_v46 }
 0x723   : > { %3519 = vmatpush3.bf16.msra.mxu1 %v3737_v47  ;;  %3522 = vmatprep.mubr.msk.bf16.mxu1 %vm3850_vm0, %v3849_v2 }
 0x724   : > { %3520 = vmatprep.subr.bf16.mxu1 %v3849_v2 }
 0x727   : > { %3521 = vmatpush3.bf16.msra.mxu1 %v3738_v48 }
 0x728   : > { %3532 = vmatprep.subr.bf16.mxu1 %v3849_v2 }
 0x7ed   : > { %v1948_v51 = vpop.f32.mrb[32].mxu1 }
 0x7ee   : > { %v1954_v52 = vpack.c.bf16 %v1948_v51, %v1948_v51  ;;  %v3502_v53 = vpop.f32.mrb[33].mxu1 }
 0x7ef   : > { %v1951_v54 = vpop.f32.mrb[34].mxu1 }
 0x7f0   : > { %v3503_v55 = vpop.f32.mrb[35].mxu1  ;;  %3523 = vmatmul.mubr.msk.bf16.vlgmr.msra.gmra.mrb[40].mxu1 %vm2022_vm6, %v1954_v52 }
 0x7f1   : > { %3536 = vmatprep.mubr.msk.bf16.mxu1 %vm3850_vm0, %v3849_v2  ;;  %3533 = vmatpush3.bf16.msra.mxu1 %v3741_v0 }
 0x7f2   : > { %3534 = vmatprep.subr.bf16.mxu1 %v3849_v2 }
 0x7f5   : > { %v1998_v56 = vpop.f32.mrb[36].mxu1  ;;  %3535 = vmatpush3.bf16.msra.mxu1 %v3742_v1 }
 0x7f6   : > { %v2004_v57 = vpack.c.bf16 %v1998_v56, %v1998_v56  ;;  %v3508_v58 = vpop.f32.mrb[37].mxu1  ;;  %3546 = vmatprep.subr.bf16.mxu1 %v3849_v2  ;;  %v3159_v56 = vld [vmem:[%s4572_s14 + $0x2] sm:$0x1] }
 0x7f7   : > { %v2001_v60 = vpop.f32.mrb[38].mxu1  ;;  %v3749_v58 = vld [vmem:[%s4573_s15 + $0x20] sm:$0xff]  }
 0x7f8   : > { %v3509_v61 = vpop.f32.mrb[39].mxu1  ;;  %3515 = vmatmul.mubr.msk.bf16.vlgmr.msra.gmra.mrb[40].mxu0 %vm2022_vm6, %v2004_v57  ;;  %v3168_v57 = vld [vmem:[%s4572_s14 + $0x3] sm:$0x1]  ;;  %v3750_v60 = vld [vmem:[%s4573_s15 + $0x28] sm:$0xff]  }
 0x7f9   : > { %3527 = vmatpush3.bf16.msra.mxu0 %v1912_v44  ;;  %3528 = vmatprep.mubr.msk.bf16.mxu0 %vm3850_vm0, %v3849_v2 }
 0x7fa   : > { %3540 = vmatprep.subr.bf16.mxu0 %v3849_v2 }
 0x800   : > { %3529 = vmatmul.mubr.msk.bf16.vlgmr.msra.gmra.mrb[44].mxu0 %vm1154_vm4, %v3127_v62 }
 0x801   : > { %3541 = vmatpush3.bf16.msra.mxu0 %v1912_v44  ;;  %3542 = vmatprep.mubr.msk.bf16.mxu0 %vm3850_vm0, %v3849_v2  ;;  %v3747_v44 = vld [vmem:[%s4573_s15] sm:$0xff]  }
 0x802   : > { %3554 = vmatprep.subr.bf16.mxu0 %v3849_v2 }
 0x808   : > { %3543 = vmatmul.mubr.msk.bf16.vlgmr.msra.gmra.mrb[48].mxu0 %vm1154_vm4, %v3136_v63 }
 0x809   : > { %3556 = vmatprep.mubr.msk.bf16.mxu0 %vm3850_vm0, %v3849_v2 }
 0x8c3   : > { %v2115_v4 = vpop.f32.mrb[40].mxu1 }
 0x8c4   : > { %v3524_v5 = vpop.f32.mrb[41].mxu1 }
 0x8c5   : > { %v2118_v6 = vpop.f32.mrb[42].mxu1 }
 0x8c6   : > { %v3525_v7 = vpop.f32.mrb[43].mxu1 }
 0x8cb   : > { %v2060_v8 = vpop.f32.mrb[40].mxu0 }
 0x8cc   : > { %v2116_v9 = vadd.f32 %v2115_v4, %v2060_v8  ;;  %v3516_v10 = vpop.f32.mrb[41].mxu0 }
 0x8cd   : > { %v2063_v11 = vpop.f32.mrb[42].mxu0 }
 0x8ce   : > { %v3517_v12 = vpop.f32.mrb[43].mxu0 }
 0x8d3   : > { %v2160_v13 = vpop.f32.mrb[44].mxu0 }
 0x8d4   : > { %v2166_v15 = vpack.c.bf16 %v2160_v13, %v2160_v13  ;;  %v3530_v16 = vpop.f32.mrb[45].mxu0 }
 0x8d5   : > { %v2163_v17 = vpop.f32.mrb[46].mxu0 }
 0x8d6   : > { %v3531_v18 = vpop.f32.mrb[47].mxu0  ;;  %3537 = vmatmul.mubr.msk.bf16.vlgmr.msra.gmra.mrb[44].mxu1 %vm2022_vm6, %v2166_v15 }
 0x8d7   : > { %3547 = vmatpush3.bf16.msra.mxu1 %v3743_v14  ;;  %3550 = vmatprep.mubr.msk.bf16.mxu1 %vm3850_vm0, %v3849_v2  ;;  %v3752_v14 = vld [vmem:[%s4573_s15 + $0x38] sm:$0xff]  }
 0x8d8   : > { %3548 = vmatprep.subr.bf16.mxu1 %v3849_v2 }
 0x8db   : > { %v2267_v20 = vpop.f32.mrb[48].mxu0  ;;  %3549 = vmatpush3.bf16.msra.mxu1 %v3744_v19 }
 0x8dc   : > { %v2273_v21 = vpack.c.bf16 %v2267_v20, %v2267_v20  ;;  %v3544_v22 = vpop.f32.mrb[49].mxu0  ;;  %3560 = vmatprep.subr.bf16.mxu1 %v3849_v2  ;;  %v2785_v20 = vld [vmem:[%s4575_s17] sm:$0xff] }
 0x8dd   : > { %v2270_v23 = vpop.f32.mrb[50].mxu0 }
 0x8de   : > { %v3545_v24 = vpop.f32.mrb[51].mxu0  ;;  %3551 = vmatmul.mubr.msk.bf16.vlgmr.msra.gmra.mrb[48].mxu1 %vm2022_vm6, %v2273_v21  ;;  %v2786_v21 = vld [vmem:[%s4575_s17 + $0x8] sm:$0xff]  ;;  %v2788_v23 = vld [vmem:[%s4575_s17 + $0x18] sm:$0xff] }
 0x8df   : > { %3562 = vmatprep.mubr.msk.bf16.mxu1 %vm3850_vm0, %v3849_v2  ;;  %v3649_v22 = vpack.c.bf16 %v2786_v21, %v2785_v20 }
 0x9a9   : > { %v2221_v25 = vpop.f32.mrb[44].mxu1 }
 0x9aa   : > { %v2227_v26 = vadd.f32 %v2221_v25, %v2116_v9  ;;  %v3538_v27 = vpop.f32.mrb[45].mxu1  ;;  %v3751_v9 = vld [vmem:[%s4573_s15 + $0x30] sm:$0xff]   ;;  %v3178_v25 = vld [vmem:[#allocation3] ss:$0 sm:$0xff] }
 0x9ab   : > { %v2224_v28 = vpop.f32.mrb[46].mxu1  ;;  %2796 = vperm.xlu0 %3703, %v3178_v25  }
 0x9ac   : > { %v3539_v29 = vpop.f32.mrb[47].mxu1 }
 0x9b1   : > { %v2328_v30 = vpop.f32.mrb[48].mxu1 }
 0x9b2   : > { %v2334_v32 = vadd.f32 %v2328_v30, %v2227_v26  ;;  %v3552_v33 = vpop.f32.mrb[49].mxu1 }
 0x9b3   : > { %v2331_v3 = vpop.f32.mrb[50].mxu1 }
 0x9b4   : > { %v2342_v34 = vadd.f32 %v3145_v31, %v2334_v32  ;;  %v3553_v35 = vpop.f32.mrb[51].mxu1  ;;  %v3177_v31 = vld [vmem:[%s4574_s16] ss:$0 sm:$0xff] }
 0x9b6   : > { %v2343_v36 = vmul.f32 0.2, %v2342_v34 }
 0x9b8   : > { %v2344_v37 = vmax.f32 %v2342_v34, %v2343_v36 }
 0x9ba   : > { %v2345_v38 = vpack.c.bf16 %v2344_v37, %v2344_v37 }
 0x9bc   : > { %v2353_v39 = vsel %vm2351_vm7, %v2345_v38, 0 }
 0x9bd   : > { %3555 = vmatpush3.bf16.msra.mxu0 %v2353_v39  ;;  %3561 = vmatpush3.bf16.msra.mxu1 %v2353_v39 }
 0x9be   : > { %3566 = vmatprep.subr.bf16.mxu0 %v3849_v2  ;;  %3574 = vmatprep.subr.bf16.mxu1 %v3849_v2 }
 0x9c0   : > { %3563 = vmatmul.mubr.msk.bf16.vlgmr.msra.gmra.mrb[52].mxu1 %vm2347_vm8, %v3147_v40  ;;  %3557 = vmatmul.mubr.msk.bf16.vlgmr.msra.gmra.mrb[52].mxu0 %vm2347_vm8, %v2346_v41 }
 0x9c1   : > { %3567 = vmatpush3.bf16.msra.mxu0 %v3745_v42  ;;  %3570 = vmatprep.mubr.msk.bf16.mxu0 %vm3850_vm0, %v3849_v2 }
 0x9c2   : > { %3568 = vmatprep.subr.bf16.mxu0 %v3849_v2  ;;  %3578 = vmatprep.mubr.msk.bf16.mxu1 %vm3850_vm0, %v3849_v2 }
 0x9c3   : > { %3575 = vmatpush3.bf16.msra.mxu1 %v3747_v44 }
 0x9c4   : > { %3576 = vmatprep.subr.bf16.mxu1 %v3849_v2 }
 0x9c5   : > { %3569 = vmatpush3.bf16.msra.mxu0 %v3746_v43 }
 0x9c6   : > { %3582 = vmatprep.subr.bf16.mxu0 %v3849_v2 }
 0x9c7   : > { %3577 = vmatpush3.bf16.msra.mxu1 %v3748_v45 }
 0x9c8   : > { %3588 = vmatprep.subr.bf16.mxu1 %v3849_v2 }
 0xa93   : > { %v2439_v46 = vpop.f32.mrb[52].mxu1  ;;  %v2389_v47 = vpop.f32.mrb[52].mxu0 }
 0xa94   : > { %v2445_v48 = vpack.c.bf16 %v2439_v46, %v2439_v46  ;;  %v3564_v49 = vpop.f32.mrb[53].mxu1  ;;  %v2395_v50 = vpack.c.bf16 %v2389_v47, %v2389_v47  ;;  %v3558_v51 = vpop.f32.mrb[53].mxu0 }
 0xa95   : > { %v2442_v52 = vpop.f32.mrb[54].mxu1  ;;  %v2392_v53 = vpop.f32.mrb[54].mxu0 }
 0xa96   : > { %3571 = vmatmul.mubr.msk.bf16.vlgmr.msra.gmra.mrb[56].mxu0 %vm2022_vm6, %v2445_v48  ;;  %v3565_v54 = vpop.f32.mrb[55].mxu1  ;;  %3579 = vmatmul.mubr.msk.bf16.vlgmr.msra.gmra.mrb[56].mxu1 %vm2022_vm6, %v2395_v50  ;;  %v3559_v55 = vpop.f32.mrb[55].mxu0 }
 0xa97   : > { %3583 = vmatpush3.bf16.msra.mxu0 %v2353_v39  ;;  %3584 = vmatprep.mubr.msk.bf16.mxu0 %vm3850_vm0, %v3849_v2 }
 0xa98   : > { %3596 = vmatprep.subr.bf16.mxu0 %v3849_v2  ;;  %3592 = vmatprep.mubr.msk.bf16.mxu1 %vm3850_vm0, %v3849_v2 }
 0xa99   : > { %3589 = vmatpush3.bf16.msra.mxu1 %v3749_v58 }
 0xa9a   : > { %3590 = vmatprep.subr.bf16.mxu1 %v3849_v2 }
 0xa9d   : > { %3591 = vmatpush3.bf16.msra.mxu1 %v3750_v60 }
 0xa9e   : > { %3585 = vmatmul.mubr.msk.bf16.vlgmr.msra.gmra.mrb[60].mxu0 %vm2347_vm8, %v3159_v56  ;;  %3602 = vmatprep.subr.bf16.mxu1 %v3849_v2 }
 0xa9f   : > { %3597 = vmatpush3.bf16.msra.mxu0 %v2353_v39  ;;  %3598 = vmatprep.mubr.msk.bf16.mxu0 %vm3850_vm0, %v3849_v2 }
 0xaa0   : > { %3648 = vmatprep.subr.bf16.mxu0 %v3851_v59 }
 0xaa6   : > { %3599 = vmatmul.mubr.msk.bf16.vlgmr.msra.gmra.mrb[64].mxu0 %vm2347_vm8, %v3168_v57 }
 0xaa7   : > { %3618 = vmatprep.mubr.msk.f32.mxu0 %vm3850_vm0, %v3849_v2  ;;  %3650 = vmatpush3.bf16.msra.mxu0 %v3649_v22 }
 0xaa8   : > { %3651 = vmatprep.subr.bf16.mxu0 %v3851_v59 }
 0xb69   : > { %v2500_v61 = vpop.f32.mrb[56].mxu0  ;;  %v2555_v62 = vpop.f32.mrb[56].mxu1 }
 0xb6a   : > { %v3572_v63 = vpop.f32.mrb[57].mxu0  ;;  %v2556_v0 = vadd.f32 %v2555_v62, %v2500_v61  ;;  %v3580_v1 = vpop.f32.mrb[57].mxu1 }
 0xb6b   : > { %v2503_v4 = vpop.f32.mrb[58].mxu0  ;;  %v2558_v5 = vpop.f32.mrb[58].mxu1 }
 0xb6c   : > { %v3573_v6 = vpop.f32.mrb[59].mxu0  ;;  %v3581_v7 = vpop.f32.mrb[59].mxu1 }
 0xb71   : > { %v2600_v8 = vpop.f32.mrb[60].mxu0 }
 0xb72   : > { %v2606_v10 = vpack.c.bf16 %v2600_v8, %v2600_v8  ;;  %v3586_v11 = vpop.f32.mrb[61].mxu0 }
 0xb73   : > { %v2603_v12 = vpop.f32.mrb[62].mxu0 }
 0xb74   : > { %3593 = vmatmul.mubr.msk.bf16.vlgmr.msra.gmra.mrb[60].mxu1 %vm2022_vm6, %v2606_v10  ;;  %v3587_v13 = vpop.f32.mrb[63].mxu0 }
 0xb75   : > { %3603 = vmatpush3.bf16.msra.mxu1 %v3751_v9  ;;  %3606 = vmatprep.mubr.msk.bf16.mxu1 %vm3850_vm0, %v3849_v2 }
 0xb76   : > { %3604 = vmatprep.subr.bf16.mxu1 %v3849_v2  ;;  %v2787_v2 = vld [vmem:[%s4575_s17 + $0x10] sm:$0xff] }
 0xb77   : > { %v3652_v24 = vpack.c.bf16 %v2788_v23, %v2787_v2 }
 0xb79   : > { %v2707_v15 = vpop.f32.mrb[64].mxu0  ;;  %3605 = vmatpush3.bf16.msra.mxu1 %v3752_v14  ;;  %3653 = vmatpush3.bf16.msra.mxu0 %v3652_v24 }
 0xb7a   : > { %v2713_v16 = vpack.c.bf16 %v2707_v15, %v2707_v15  ;;  %v3600_v17 = vpop.f32.mrb[65].mxu0 }
 0xb7b   : > { %v2710_v18 = vpop.f32.mrb[66].mxu0 }
 0xb7c   : > { %3607 = vmatmul.mubr.msk.bf16.vlgmr.msra.gmra.mrb[64].mxu1 %vm2022_vm6, %v2713_v16  ;;  %v3601_v19 = vpop.f32.mrb[67].mxu0 }
 0xc47   : > { %v2661_v26 = vpop.f32.mrb[60].mxu1 }
 0xc48   : > { %v2667_v27 = vadd.f32 %v2661_v26, %v2556_v0  ;;  %v3594_v28 = vpop.f32.mrb[61].mxu1 }
 0xc49   : > { %v2664_v29 = vpop.f32.mrb[62].mxu1 }
 0xc4a   : > { %v3595_v59 = vpop.f32.mrb[63].mxu1 }
 0xc4f   : > { %v2768_v30 = vpop.f32.mrb[64].mxu1 }
 0xc50   : > { %v2774_v32 = vadd.f32 %v2768_v30, %v2667_v27  ;;  %v3608_v33 = vpop.f32.mrb[65].mxu1 }
 0xc51   : > { %v2771_v3 = vpop.f32.mrb[66].mxu1 }
 0xc52   : > { %v2782_v34 = vadd.f32 %v3177_v31, %v2774_v32  ;;  %v3609_v35 = vpop.f32.mrb[67].mxu1 }
 0xc54   : > { %v2783_v36 = vmul.f32 0.2, %v2782_v34 }
 0xc56   : > { %v2784_v37 = vmax.f32 %v2782_v34, %v2783_v36 }
 0xc58   : > { %3619 = vmatmul.mubr.msk.f32.vlgmr.msra.gmra.mrb[38].mxu0 %vm2022_vm6, %v2784_v37 }
 0xc59   : > { %3766 = shalt.err (!%p3763_p3)
}
 0xc5a   : > { %s3767_s2 = scalar_lea.hbm %s4489_s24, 64  ;;  %s3771_s23 = scalar_lea.hbm %s4576_s19, 128 }
 0xc5b   : > { %p3768_p4 = scmp.ne.s32.totalorder %s4489_s24, %s3767_s2  ;;  %p3772_p9 = scmp.lt.u32.totalorder %s4489_s24, %s4576_s19 }
 0xc5c   : > { %p3773_p10 = scmp.lt.u32.totalorder %s3771_s23, %s3767_s2  ;;  %p3775_p12 = scmp.lt.u32.totalorder %s3767_s2, %s4489_s24 }
 0xc5d   : > { %p3769_p7 = pnand %p3768_p4, %p4004_p5 }
 0xc5e   : > { %p3774_p11 = por %p3773_p10, %p3772_p9 }
 0xc5f   : > { %p3770_p8 = pneg %p3769_p7 }
 0xc60   : > { %p3776_p13 = por %p3775_p12, %p3774_p11 }
 0xc62   : > { %p3777_p0 = pnand %p3776_p13, %p3770_p8 }
 0xc64   : > { %3780 = shalt.err (!%p3777_p0)
}
 0xc65   : > { %3655 = dma.vmem_to_hbm [thread:$0]  (%p4004_p5), %s2894_s18, 64, %s4489_s24, %s2875_s28   ;;  %v2797_v38 = vpop.permute.xlu0 %2796  ;;  %vm2872_vm9 = vcmask 9216  }
 0xc66   : > { %s3002_s4 = sshll.u32 %s4314_s22, 1  ;;  %s3183_s3 = sshll.u32 %s3987_s8, 5 }
 0xc67   : > { %s637_s26 = scalar_lea.vmem [#allocation6], %s3002_s4  ;;  %s4609_s21 = sld [smem:[#allocation21_spill]] }
 0xc68   : > { %s2906_s0 = sshll.u32 %s637_s26, 4  ;;  %s2880_s24 = scalar_lea.sflag [#allocation7], %s4314_s22  ;;  %s4517_s0 = int_to_ptr.vmem [resolvable:$true] %s2906_s0 }
 0xc69   : > { %s3781_s8 = scalar_lea.vmem %s4517_s0, 32  ;;  %s3854_s18 = smov [#allocation6]  }
 0xc6a   : > { %p3782_p1 = scmp.ne.s32.totalorder %s4517_s0, %s3781_s8  ;;  %s3785_s28 = sshll.u32 %s3854_s18, 4  ;;  %s3786_s28 = int_to_ptr.vmem [resolvable:$false] %s3785_s28 }
 0xc6b   : > { %s3787_s4 = scalar_lea.vmem %s3786_s28, 64  ;;  %p3788_p4 = scmp.lt.s32.totalorder %s4517_s0, %s3786_s28 }
 0xc6c   : > { %p3783_p2 = pnand %p3782_p1, %p4004_p5  ;;  %p3789_p7 = scmp.lt.s32.totalorder %s3787_s4, %s3781_s8 }
 0xc6d   : > { %s4515_s1 = scalar_lea.hbm %s4609_s21, %s3183_s3 }
 0xc6e   : > { %p3784_p3 = pneg %p3783_p2  ;;  %p3790_p8 = por %p3789_p7, %p3788_p4 }
 0xc70   : > { %p3791_p9 = pnand %p3790_p8, %p3784_p3 }
 0xd2b   : > { %v2868_v39 = vpop.f32.mrb[38].mxu0 }
 0xd2c   : > { %v2869_v40 = vadd.f32 %v2868_v39, %v2797_v38  ;;  %v3620_v41 = vpop.f32.mrb[39].mxu0 }
 0xd2e   : > { %2873 = vst.msk [vmem:[%s637_s26] sm:$0x3] %vm2872_vm9, %v2869_v40 }
 0xd2f   : > { %3794 = shalt.err (!%p3791_p9)
}
 0xd30   : > { %s3795_s22 = scalar_lea.hbm %s4515_s1, 32  ;;  %s3799_s2 = scalar_lea.hbm %s4609_s21, 64 }
 0xd31   : > { %p3796_p10 = scmp.ne.s32.totalorder %s4515_s1, %s3795_s22  ;;  %p3800_p13 = scmp.lt.u32.totalorder %s4515_s1, %s4609_s21 }
 0xd32   : > { %p3801_p0 = scmp.lt.u32.totalorder %s3799_s2, %s3795_s22  ;;  %p3803_p2 = scmp.lt.u32.totalorder %s3795_s22, %s4515_s1 }
 0xd33   : > { %p3797_p11 = pnand %p3796_p10, %p4004_p5 }
 0xd34   : > { %p3802_p1 = por %p3801_p0, %p3800_p13 }
 0xd35   : > { %p3798_p12 = pneg %p3797_p11 }
 0xd36   : > { %p3804_p3 = por %p3803_p2, %p3802_p1 }
 0xd38   : > { %p3805_p4 = pnand %p3804_p3, %p3798_p12 }
 0xd3a   : > { %3808 = shalt.err (!%p3805_p4)
}
 0xd3b   : > { %3656 = dma.vmem_to_hbm [thread:$0]  (%p4004_p5), %s4517_s0, 32, %s4515_s1, %s2880_s24  }
 0xd3c PF: > { %s4610_s8 = sld [smem:[#allocation12_spill]]  ;;  %s4611_s28 = sld [smem:[#allocation10_spill]] }
 0xd42   : > { %p3666_p7 = scmp.ge.s32.totalorder %s4610_s8, 2  ;;  %s2918_s3 = sand.u32 1, %s4611_s28  }
 0xd43   : > { %s2919_s26 = scalar_lea.sflag [#allocation5], %s2918_s3 }
 0xd44   : > { %p3660_p8 = pnand %p3666_p7, %p4008_p6 }
 0xd46   : > { %3826 = dma.done.wait (!%p3660_p8), %s2919_s26, 64  }
 0xd47   : > { %3828 = vsyncadd (!%p3660_p8), %s2919_s26, 4294967232  ;;  %s2928_s22 = scalar_lea.sflag [#allocation7], %s2918_s3 }
 0xd48   : > { %3830 = dma.done.wait (!%p3660_p8), %s2928_s22, 32  }
 0xd49   : > { %3832 = vsyncadd (!%p3660_p8), %s2928_s22, 4294967264  ;;  %s4613_s26 = sld [smem:[#allocation13_spill]]  ;;  %s4614_s30 = sld [smem:[#allocation11_spill]] }
 0xd4a   : > { %s4615_s3 = sld [smem:[#allocation14_spill]]  ;;  %s4616_s2 = smov %s3839_s25 }
 0xd4f   : > { %p38_p5 = scmp.ge.s32.totalorder %s4613_s26, 4   ;;  %s4617_s25 = smov %s4614_s30 }
 0xd51   :  { %40 = sbr.rel (!%p38_p5) target bundleno = 12 (0xc), region = 172 }
 0xd58   :  { %2933 = vsyncpa [#allocation5], 1 }
 0xd59   :  { %2935 = vsyncpa [#allocation5 + $0x1], 1 }
 0xd5a   :  { %2936 = vsyncpa [#allocation7], 1 }
 0xd5b   :  { %2938 = vsyncpa [#allocation7 + $0x1], 1 }

</bundles_post_ra>
